<compile_context>
chip_gen: v7x
topology: tpu7x:2x2x1
jax: 0.10.0
libtpu: 0.0.40
codegen_flags: <defaults>
</compile_context>

<pallas_src>
import functools

import jax
import jax.numpy as jnp
from jax.experimental import pallas as pl
from jax.experimental.pallas import tpu as pltpu

EPS = 1e-5
LANE = 128


def _vmem_limit_bytes():
    """Generation-aware VMEM limit: ~3/4 of physical capacity, capped at 100 MiB."""
    try:
        cap = int(pltpu.get_tpu_info().vmem_capacity_bytes)
    except Exception:
        cap = 64 * 1024 * 1024  # conservative fallback (v7x per-TensorCore VMEM)
    return int(min(cap * 3 // 4, 100 * 1024 * 1024))


def _pick_band_height(H, W, Cin_p, Cpad, budget_bytes):
    """Largest divisor of H whose per-step VMEM footprint fits the byte budget."""
    per_row = W * (
        4 * Cpad            # f32 matmul result (live in VMEM)
        + 2 * 2 * Cpad      # bf16 y output block, double-buffered
        + 2 * 9 * Cin_p     # bf16 fused-tap LHS scratch
        + 2 * 2 * Cin_p     # bf16 x band, double-buffered (halo ignored)
    )
    fixed = 2 * 2 * 9 * Cin_p * Cpad  # double-buffered bf16 weights
    avail = max(budget_bytes - fixed, per_row)
    max_th = max(1, avail // per_row)
    th = 1
    for cand in range(2, H + 1):
        if H % cand == 0 and cand <= max_th:
            th = cand
    return th


def _conv_stats_kernel(x_ref, w_ref, y_ref, sum_ref, sq_ref, lhs_ref, *, TH, W, Cin_p):
    # x_ref:   (1, TH+2, W+2, Cin_p) bf16   row band with 1-px halo
    # w_ref:   (9*Cin_p, Cpad)       bf16   conv weight, (kh, kw, cin)-major
    # y_ref:   (1, TH*W, Cpad)       bf16   conv output for this band
    # sum_ref: (1, 1, Cpad)          f32    per-band BN partial sum
    # sq_ref:  (1, 1, Cpad)          f32    per-band BN partial sum of squares
    # lhs_ref: (TH*W, 9*Cin_p)       bf16   VMEM scratch: fused-tap im2col LHS
    x = x_ref[0]
    # Pack the 9 shifted windows next to each other along the contraction axis so a single
    # K = 9*Cin_p matmul feeds the MXU (vs. nine badly underfilled K = Cin_p dots).
    for kh in range(3):
        for kw in range(3):
            t = kh * 3 + kw
            lhs_ref[:, t * Cin_p:(t + 1) * Cin_p] = (
                x[kh:kh + TH, kw:kw + W, :].reshape(TH * W, Cin_p)
            )
    acc = jnp.dot(lhs_ref[...], w_ref[...], preferred_element_type=jnp.float32)
    y_ref[0] = acc.astype(y_ref.dtype)  # bf16 writeback: halves HBM bytes of the big tensor
    # BN partials reduced in f32 from the f32 accumulator (precision preserved).
    sum_ref[0] = jnp.sum(acc, axis=0, keepdims=True)
    sq_ref[0] = jnp.sum(acc * acc, axis=0, keepdims=True)


@jax.jit
def conv_block_forward(x_nchw, weight_oihw, gamma, beta):
    """x: (N, Cin, H, W); weight: (Cout, Cin, 3, 3); gamma/beta: (Cout,). Returns NCHW f32."""
    N, Cin, H, W = x_nchw.shape
    Cout, Cin_w, KH, KW = weight_oihw.shape
    assert (KH, KW) == (3, 3) and Cin_w == Cin

    Cin_p = max(8, ((Cin + 7) // 8) * 8)                     # sublane-friendly K pieces
    lane_mult = 256 if Cout >= 256 else LANE                  # fill 256-wide MXU N (v6e/v7x)
    Cpad = max(LANE, ((Cout + lane_mult - 1) // lane_mult) * lane_mult)

    vmem_limit = _vmem_limit_bytes()
    TH = _pick_band_height(H, W, Cin_p, Cpad, vmem_limit // 2)
    NB = H // TH
    NBT = N * NB                                              # grid steps (megacore-sharded)
    THP, WP = TH + 2, W + 2

    # ---- glue: NCHW -> NHWC, halo pad, pad Cin, cast bf16 for the MXU ----
    x_nhwc = jnp.transpose(x_nchw, (0, 2, 3, 1))
    xp = jnp.pad(x_nhwc, ((0, 0), (1, 1), (1, 1), (0, Cin_p - Cin))).astype(jnp.bfloat16)
    if NB == 1:
        x_bands = xp                                          # no halo duplication needed
    else:
        bands = jnp.stack([xp[:, b * TH:b * TH + THP] for b in range(NB)], axis=1)
        x_bands = bands.reshape(NBT, THP, WP, Cin_p)

    # Weight: (Cout, Cin, 3, 3) -> (kh, kw, cin, cout), pad, flatten to (9*Cin_p, Cpad) bf16.
    w2 = jnp.transpose(weight_oihw.astype(jnp.float32), (2, 3, 1, 0))
    w2 = jnp.pad(w2, ((0, 0), (0, 0), (0, Cin_p - Cin), (0, Cpad - Cout)))
    w2 = w2.reshape(KH * KW * Cin_p, Cpad).astype(jnp.bfloat16)

    cparams = pltpu.CompilerParams(
        dimension_semantics=("parallel",),
        vmem_limit_bytes=vmem_limit,
    )

    # ---- single Pallas pass: conv (one fused-K MXU matmul / band) + BN partial sums ----
    kern = functools.partial(_conv_stats_kernel, TH=TH, W=W, Cin_p=Cin_p)
    y, ysum, ysq = pl.pallas_call(
        kern,
        grid=(NBT,),
        in_specs=[
            pl.BlockSpec((1, THP, WP, Cin_p), lambda i: (i, 0, 0, 0)),
            pl.BlockSpec((KH * KW * Cin_p, Cpad), lambda i: (0, 0)),
        ],
        out_specs=(
            pl.BlockSpec((1, TH * W, Cpad), lambda i: (i, 0, 0)),
            pl.BlockSpec((1, 1, Cpad), lambda i: (i, 0, 0)),
            pl.BlockSpec((1, 1, Cpad), lambda i: (i, 0, 0)),
        ),
        out_shape=(
            jax.ShapeDtypeStruct((NBT, TH * W, Cpad), jnp.bfloat16),
            jax.ShapeDtypeStruct((NBT, 1, Cpad), jnp.float32),
            jax.ShapeDtypeStruct((NBT, 1, Cpad), jnp.float32),
        ),
        scratch_shapes=[pltpu.VMEM((TH * W, KH * KW * Cin_p), jnp.bfloat16)],
        compiler_params=cparams,
    )(x_bands, w2)

    # ---- fold BN (train mode, biased variance) + ReLU + slice + transpose in XLA ----
    # Note: E[y^2]-E[y]^2 in f32 can cancel for extreme means; fine for conv-scale outputs.
    m_total = jnp.float32(N * H * W)
    e1 = (jnp.sum(ysum, axis=(0, 1)) / m_total)[:Cout]
    e2 = (jnp.sum(ysq, axis=(0, 1)) / m_total)[:Cout]
    var = jnp.maximum(e2 - e1 * e1, 0.0)
    inv = jax.lax.rsqrt(var + EPS)
    scale = gamma.astype(jnp.float32) * inv
    shift = beta.astype(jnp.float32) - e1 * scale

    y32 = y[..., :Cout].astype(jnp.float32)                   # drop padded lanes first
    out = jnp.maximum(y32 * scale + shift, 0.0)                # single fused FMA + ReLU
    out = out.reshape(N, NB, TH, W, Cout)
    return jnp.transpose(out, (0, 4, 1, 2, 3)).reshape(N, Cout, H, W)


def conv_block_reference(x_nchw, weight_oihw, gamma, beta):
    """Pure-JAX f32 reference of the same forward (train-mode BN)."""
    y = jax.lax.conv_general_dilated(
        x_nchw.astype(jnp.float32),
        weight_oihw.astype(jnp.float32),
        window_strides=(1, 1),
        padding=((1, 1), (1, 1)),
        dimension_numbers=("NCHW", "OIHW", "NCHW"),
    )
    mean = jnp.mean(y, axis=(0, 2, 3), keepdims=True)
    var = jnp.mean(jnp.square(y - mean), axis=(0, 2, 3), keepdims=True)
    y = (y - mean) * jax.lax.rsqrt(var + EPS)
    y = y * gamma.reshape(1, -1, 1, 1) + beta.reshape(1, -1, 1, 1)
    return jnp.maximum(y, 0.0)


if __name__ == "__main__":
    # Small shapes consistent with the module: batch=2, in_ch=4, out_ch=8, 16x16 spatial.
    N, Cin, H, W = 2, 4, 16, 16
    Cout = 8

    key = jax.random.PRNGKey(0)
    kx, kwt = jax.random.split(key)
    x = jax.random.normal(kx, (N, Cin, H, W), dtype=jnp.float32)
    weight = 0.1 * jax.random.normal(kwt, (Cout, Cin, 3, 3), dtype=jnp.float32)
    gamma = jnp.ones((Cout,), dtype=jnp.float32)
    beta = jnp.zeros((Cout,), dtype=jnp.float32)
    # TODO(synk): BatchNorm running_mean/running_var updates (training-side state) are not
    # modeled; only the forward output (train-mode batch statistics) is produced.

    out = jax.block_until_ready(conv_block_forward(x, weight, gamma, beta))
    ref = jax.block_until_ready(conv_block_reference(x, weight, gamma, beta))

    assert out.shape == (N, Cout, H, W)
    # bf16 MXU operands + bf16 conv-output storage (f32 accumulation / stats) -> loose tol.
    max_err = float(jnp.max(jnp.abs(out - ref)))
    assert jnp.allclose(out, ref, atol=3e-2, rtol=3e-2), max_err

    print("KERNEL_OK")
</pallas_src>

<mosaic_0001>
module attributes {stable_mosaic.version = 11 : i64} {
  func.func @_conv_stats_kernel(%arg0: i32, %arg1: memref<1x18x18x8xbf16, #tpu.memory_space<vmem>>, %arg2: memref<72x128xbf16, #tpu.memory_space<vmem>>, %arg3: memref<1x256x128xbf16, #tpu.memory_space<vmem>>, %arg4: memref<1x1x128xf32, #tpu.memory_space<vmem>>, %arg5: memref<1x1x128xf32, #tpu.memory_space<vmem>>, %arg6: memref<256x72xbf16, #tpu.memory_space<vmem>>) attributes {dimension_semantics = [#tpu.dimension_semantics<parallel>], iteration_bounds = array<i64: 2>, scalar_prefetch = 0 : i64, scratch_operands = 1 : i64, tpu.core_type = #tpu.core_type<tc>, window_params = [{transform_indices = @transform_0, window_bounds = array<i64: 1, 18, 18, 8>}, {pipeline_mode = #tpu.pipeline_mode<synchronous>, transform_indices = @transform_1, window_bounds = array<i64: 72, 128>}, {transform_indices = @transform_2, window_bounds = array<i64: 1, 256, 128>}, {transform_indices = @transform_3, window_bounds = array<i64: 1, 1, 128>}, {transform_indices = @transform_4, window_bounds = array<i64: 1, 1, 128>}]} {
    %c0 = arith.constant 0 : index
    %c0_0 = arith.constant 0 : index
    %c0_1 = arith.constant 0 : index
    %c0_2 = arith.constant 0 : index
    %0 = vector.load %arg1[%c0, %c0_0, %c0_1, %c0_2] : memref<1x18x18x8xbf16, #tpu.memory_space<vmem>>, vector<1x18x18x8xbf16>
    %1 = vector.shape_cast %0 : vector<1x18x18x8xbf16> to vector<18x18x8xbf16>
    %2 = vector.extract_strided_slice %1 {offsets = [0, 0, 0], sizes = [16, 16, 8], strides = [1, 1, 1]} : vector<18x18x8xbf16> to vector<16x16x8xbf16>
    %3 = vector.shape_cast %2 : vector<16x16x8xbf16> to vector<256x8xbf16>
    %c0_3 = arith.constant 0 : index
    %c0_4 = arith.constant 0 : index
    %4 = vector.load %arg6[%c0_3, %c0_4] : memref<256x72xbf16, #tpu.memory_space<vmem>>, vector<256x8xbf16>
    tpu.vector_store %arg6[%c0_3, %c0_4], %3 {strides = array<i32>} : memref<256x72xbf16, #tpu.memory_space<vmem>>, vector<256x8xbf16>,
    %5 = vector.extract_strided_slice %1 {offsets = [0, 1, 0], sizes = [16, 16, 8], strides = [1, 1, 1]} : vector<18x18x8xbf16> to vector<16x16x8xbf16>
    %6 = vector.shape_cast %5 : vector<16x16x8xbf16> to vector<256x8xbf16>
    %c0_5 = arith.constant 0 : index
    %c8 = arith.constant 8 : index
    %7 = vector.load %arg6[%c0_5, %c8] : memref<256x72xbf16, #tpu.memory_space<vmem>>, vector<256x8xbf16>
    tpu.vector_store %arg6[%c0_5, %c8], %6 {strides = array<i32>} : memref<256x72xbf16, #tpu.memory_space<vmem>>, vector<256x8xbf16>,
    %8 = vector.extract_strided_slice %1 {offsets = [0, 2, 0], sizes = [16, 16, 8], strides = [1, 1, 1]} : vector<18x18x8xbf16> to vector<16x16x8xbf16>
    %9 = vector.shape_cast %8 : vector<16x16x8xbf16> to vector<256x8xbf16>
    %c0_6 = arith.constant 0 : index
    %c16 = arith.constant 16 : index
    %10 = vector.load %arg6[%c0_6, %c16] : memref<256x72xbf16, #tpu.memory_space<vmem>>, vector<256x8xbf16>
    tpu.vector_store %arg6[%c0_6, %c16], %9 {strides = array<i32>} : memref<256x72xbf16, #tpu.memory_space<vmem>>, vector<256x8xbf16>,
    %11 = vector.extract_strided_slice %1 {offsets = [1, 0, 0], sizes = [16, 16, 8], strides = [1, 1, 1]} : vector<18x18x8xbf16> to vector<16x16x8xbf16>
    %12 = vector.shape_cast %11 : vector<16x16x8xbf16> to vector<256x8xbf16>
    %c0_7 = arith.constant 0 : index
    %c24 = arith.constant 24 : index
    %13 = vector.load %arg6[%c0_7, %c24] : memref<256x72xbf16, #tpu.memory_space<vmem>>, vector<256x8xbf16>
    tpu.vector_store %arg6[%c0_7, %c24], %12 {strides = array<i32>} : memref<256x72xbf16, #tpu.memory_space<vmem>>, vector<256x8xbf16>,
    %14 = vector.extract_strided_slice %1 {offsets = [1, 1, 0], sizes = [16, 16, 8], strides = [1, 1, 1]} : vector<18x18x8xbf16> to vector<16x16x8xbf16>
    %15 = vector.shape_cast %14 : vector<16x16x8xbf16> to vector<256x8xbf16>
    %c0_8 = arith.constant 0 : index
    %c32 = arith.constant 32 : index
    %16 = vector.load %arg6[%c0_8, %c32] : memref<256x72xbf16, #tpu.memory_space<vmem>>, vector<256x8xbf16>
    tpu.vector_store %arg6[%c0_8, %c32], %15 {strides = array<i32>} : memref<256x72xbf16, #tpu.memory_space<vmem>>, vector<256x8xbf16>,
    %17 = vector.extract_strided_slice %1 {offsets = [1, 2, 0], sizes = [16, 16, 8], strides = [1, 1, 1]} : vector<18x18x8xbf16> to vector<16x16x8xbf16>
    %18 = vector.shape_cast %17 : vector<16x16x8xbf16> to vector<256x8xbf16>
    %c0_9 = arith.constant 0 : index
    %c40 = arith.constant 40 : index
    %19 = vector.load %arg6[%c0_9, %c40] : memref<256x72xbf16, #tpu.memory_space<vmem>>, vector<256x8xbf16>
    tpu.vector_store %arg6[%c0_9, %c40], %18 {strides = array<i32>} : memref<256x72xbf16, #tpu.memory_space<vmem>>, vector<256x8xbf16>,
    %20 = vector.extract_strided_slice %1 {offsets = [2, 0, 0], sizes = [16, 16, 8], strides = [1, 1, 1]} : vector<18x18x8xbf16> to vector<16x16x8xbf16>
    %21 = vector.shape_cast %20 : vector<16x16x8xbf16> to vector<256x8xbf16>
    %c0_10 = arith.constant 0 : index
    %c48 = arith.constant 48 : index
    %22 = vector.load %arg6[%c0_10, %c48] : memref<256x72xbf16, #tpu.memory_space<vmem>>, vector<256x8xbf16>
    tpu.vector_store %arg6[%c0_10, %c48], %21 {strides = array<i32>} : memref<256x72xbf16, #tpu.memory_space<vmem>>, vector<256x8xbf16>,
    %23 = vector.extract_strided_slice %1 {offsets = [2, 1, 0], sizes = [16, 16, 8], strides = [1, 1, 1]} : vector<18x18x8xbf16> to vector<16x16x8xbf16>
    %24 = vector.shape_cast %23 : vector<16x16x8xbf16> to vector<256x8xbf16>
    %c0_11 = arith.constant 0 : index
    %c56 = arith.constant 56 : index
    %25 = vector.load %arg6[%c0_11, %c56] : memref<256x72xbf16, #tpu.memory_space<vmem>>, vector<256x8xbf16>
    tpu.vector_store %arg6[%c0_11, %c56], %24 {strides = array<i32>} : memref<256x72xbf16, #tpu.memory_space<vmem>>, vector<256x8xbf16>,
    %26 = vector.extract_strided_slice %1 {offsets = [2, 2, 0], sizes = [16, 16, 8], strides = [1, 1, 1]} : vector<18x18x8xbf16> to vector<16x16x8xbf16>
    %27 = vector.shape_cast %26 : vector<16x16x8xbf16> to vector<256x8xbf16>
    %c0_12 = arith.constant 0 : index
    %c64 = arith.constant 64 : index
    %28 = vector.load %arg6[%c0_12, %c64] : memref<256x72xbf16, #tpu.memory_space<vmem>>, vector<256x8xbf16>
    tpu.vector_store %arg6[%c0_12, %c64], %27 {strides = array<i32>} : memref<256x72xbf16, #tpu.memory_space<vmem>>, vector<256x8xbf16>,
    %c0_13 = arith.constant 0 : index
    %c0_14 = arith.constant 0 : index
    %29 = vector.load %arg6[%c0_13, %c0_14] : memref<256x72xbf16, #tpu.memory_space<vmem>>, vector<256x72xbf16>
    %c0_15 = arith.constant 0 : index
    %c0_16 = arith.constant 0 : index
    %30 = vector.load %arg2[%c0_15, %c0_16] : memref<72x128xbf16, #tpu.memory_space<vmem>>, vector<72x128xbf16>
    %cst = arith.constant dense<0.000000e+00> : vector<256x128xf32>
    %31 = tpu.matmul %29, %30, %cst {dimension_numbers = #tpu.dot_dimension_numbers<[1], [0], [0], [1], [0, 0, 1, 1], [], []>} : vector<256x72xbf16>, vector<72x128xbf16>, vector<256x128xf32> -> vector<256x128xf32>
    %32 = arith.truncf %31 : vector<256x128xf32> to vector<256x128xbf16>
    %c0_17 = arith.constant 0 : index
    %c0_18 = arith.constant 0 : index
    %c0_19 = arith.constant 0 : index
    %33 = vector.load %arg3[%c0_17, %c0_18, %c0_19] : memref<1x256x128xbf16, #tpu.memory_space<vmem>>, vector<1x256x128xbf16>
    %34 = vector.shape_cast %33 : vector<1x256x128xbf16> to vector<256x128xbf16>
    %35 = vector.shape_cast %32 : vector<256x128xbf16> to vector<1x256x128xbf16>
    tpu.vector_store %arg3[%c0_17, %c0_18, %c0_19], %35 {strides = array<i32>} : memref<1x256x128xbf16, #tpu.memory_space<vmem>>, vector<1x256x128xbf16>,
    %cst_20 = arith.constant dense<0.000000e+00> : vector<128xf32>
    %36 = vector.multi_reduction <add>, %31, %cst_20 [0] : vector<256x128xf32> to vector<128xf32>
    %37 = vector.shape_cast %36 : vector<128xf32> to vector<1x128xf32>
    %c0_21 = arith.constant 0 : index
    %c0_22 = arith.constant 0 : index
    %c0_23 = arith.constant 0 : index
    %38 = vector.load %arg4[%c0_21, %c0_22, %c0_23] : memref<1x1x128xf32, #tpu.memory_space<vmem>>, vector<1x1x128xf32>
    %39 = vector.shape_cast %38 : vector<1x1x128xf32> to vector<1x128xf32>
    %40 = vector.shape_cast %37 : vector<1x128xf32> to vector<1x1x128xf32>
    tpu.vector_store %arg4[%c0_21, %c0_22, %c0_23], %40 {strides = array<i32>} : memref<1x1x128xf32, #tpu.memory_space<vmem>>, vector<1x1x128xf32>,
    %41 = arith.mulf %31, %31 : vector<256x128xf32>
    %cst_24 = arith.constant dense<0.000000e+00> : vector<128xf32>
    %42 = vector.multi_reduction <add>, %41, %cst_24 [0] : vector<256x128xf32> to vector<128xf32>
    %43 = vector.shape_cast %42 : vector<128xf32> to vector<1x128xf32>
    %c0_25 = arith.constant 0 : index
    %c0_26 = arith.constant 0 : index
    %c0_27 = arith.constant 0 : index
    %44 = vector.load %arg5[%c0_25, %c0_26, %c0_27] : memref<1x1x128xf32, #tpu.memory_space<vmem>>, vector<1x1x128xf32>
    %45 = vector.shape_cast %44 : vector<1x1x128xf32> to vector<1x128xf32>
    %46 = vector.shape_cast %43 : vector<1x128xf32> to vector<1x1x128xf32>
    tpu.vector_store %arg5[%c0_25, %c0_26, %c0_27], %46 {strides = array<i32>} : memref<1x1x128xf32, #tpu.memory_space<vmem>>, vector<1x1x128xf32>,
    return
  }
  func.func @transform_0(%arg0: i32) -> (i32, i32, i32, i32) {
    %c0_i32 = arith.constant 0 : i32
    %c0_i32_0 = arith.constant 0 : i32
    %c0_i32_1 = arith.constant 0 : i32
    %c0_i32_2 = arith.constant 0 : i32
    return %arg0, %c0_i32, %c0_i32_0, %c0_i32_1 : i32, i32, i32, i32
  }
  func.func @transform_1(%arg0: i32) -> (i32, i32) {
    %c0_i32 = arith.constant 0 : i32
    %c0_i32_0 = arith.constant 0 : i32
    %c0_i32_1 = arith.constant 0 : i32
    return %c0_i32, %c0_i32_0 : i32, i32
  }
  func.func @transform_2(%arg0: i32) -> (i32, i32, i32) {
    %c0_i32 = arith.constant 0 : i32
    %c0_i32_0 = arith.constant 0 : i32
    %c0_i32_1 = arith.constant 0 : i32
    return %arg0, %c0_i32, %c0_i32_0 : i32, i32, i32
  }
  func.func @transform_3(%arg0: i32) -> (i32, i32, i32) {
    %c0_i32 = arith.constant 0 : i32
    %c0_i32_0 = arith.constant 0 : i32
    %c0_i32_1 = arith.constant 0 : i32
    return %arg0, %c0_i32, %c0_i32_0 : i32, i32, i32
  }
  func.func @transform_4(%arg0: i32) -> (i32, i32, i32) {
    %c0_i32 = arith.constant 0 : i32
    %c0_i32_0 = arith.constant 0 : i32
    %c0_i32_1 = arith.constant 0 : i32
    return %arg0, %c0_i32, %c0_i32_0 : i32, i32, i32
  }
}

</mosaic_0001>

<bundles_post_ra>
// kernel: conv_block_forward.1
= control target key start
LH: loop header
LB: loop body
LE: loop exit
PB: predicated region body
PF: predicated region fallthrough
CT: control target
= control target key end

     0   :  { %s2660_s15 = smov 0   ;;  %s3615_s0 = inlined_call_operand.vmem [shape: bf16[2,18,18,8], index: 0, kind: input, shape index: {}]   ;;  %s3616_s1 = inlined_call_operand.vmem [shape: bf16[72,128], index: 1, kind: input, shape index: {}]   ;;  %s3617_s2 = inlined_call_operand.vmem [shape: bf16[2,256,128], index: 2, kind: output, shape index: {0}]   ;;  %s3618_s3 = inlined_call_operand.vmem [shape: f32[2,1,128], index: 3, kind: output, shape index: {1}]   ;;  %s3619_s4 = inlined_call_operand.vmem [shape: f32[2,1,128], index: 4, kind: output, shape index: {2}]  }
   0x1 LB: > { %s2242_s16 = sadd.s32 4294967295, %s2625_s15   ;;  %p2246_p0 = scmp.ge.s32.totalorder %s2625_s15, 1  ;;  %s2625_s15 = sphi %s2660_s15, %s15_s15  }
   0x2   : > { %p167_p1 = scmp.lt.s32.totalorder %s2625_s15, 3 }
   0x4   : > { %p168_p2 = pnand %p2246_p0, %p167_p1 }
   0x5   : > { %p199_p3 = scmp.lt.s32.totalorder (!%p168_p2), %s2242_s16, 1  ;;  %vm366_vm0 = vcmask (!%p168_p2), 64512   ;;  %vm899_vm1 = vcmask (!%p168_p2), 1042432   ;;  %vm900_vm2 = vcmask (!%p168_p2), 1046532   ;;  %vm383_vm3 = vsmask.f32 (!%p168_p2), 3328 }
   0x6   : > { %171 = sbr.rel (%p168_p2) target bundleno = 639 (0x27f), region = 28  ;;  %vm384_vm4 = vsmask.f32 (!%p168_p2), 7440  ;;  %vm2694_vm5 = vmor (!%p168_p2), %vm899_vm1, %vm900_vm2  ;;  %s2627_s21 = smov (!%p168_p2), 24   ;;  %vm1704_vm7 = vcmask (!%p168_p2), 1043456   ;;  %vm866_vm8 = vcmask (!%p168_p2), 130112  }
   0x7   : > { %s2628_s22 = smov (!%p168_p2), 40   ;;  %vm2734_vm6 = vmor (!%p168_p2), %vm383_vm3, %vm384_vm4  ;;  %s2629_s23 = smov (!%p168_p2), 16   ;;  %vm1110_vm9 = vcmask (!%p168_p2), 195712   ;;  %vm1180_vm10 = vcmask (!%p168_p2), 261312   ;;  %vm1272_vm11 = vcmask (!%p168_p2), 326912   ;;  %vm1348_vm12 = vcmask (!%p168_p2), 392512  }
   0x8   : > { %s2630_s26 = smov (!%p168_p2), 8   ;;  %s2631_s5 = smov (!%p168_p2), 32   ;;  %vm1418_vm13 = vcmask (!%p168_p2), 458112   ;;  %vm1510_vm14 = vcmask (!%p168_p2), 523712   ;;  %vm1586_vm15 = vcmask (!%p168_p2), 589312  }
   0x9   : > { %s2632_s8 = smov (!%p168_p2), 48   ;;  %s2633_s9 = smov (!%p168_p2), 56  }
   0xa   : > { %s2634_s10 = smov (!%p168_p2), 64  }
   0xd   : > { %s3625_s16 = smov (!%p199_p3, %s2242_s16), 1 }
   0xe   : > { %s2580_s17 = smul.u32 216, %s3625_s16  ;;  %s2377_s13 = sshll.u32 %s3625_s16, 7 }
   0xf   : > { %s3584_s18 = scalar_lea.vmem %s3617_s2, %s2377_s13  ;;  %s214_s24 = scalar_lea.vmem %s3619_s4, %s3625_s16 }
  0x10   : > { %s2674_s20 = scalar_lea.vmem %s3615_s0, %s2580_s17 }
  0x11   : > { %v2677_v0 = vld [vmem:[%s2674_s20 + $0x18] sm:$0xf]  ;;  %v2680_v1 = vld [vmem:[%s2674_s20 + $0x1c] sm:$0xf]  ;;  %v219_v2 = vld [vmem:[%s2674_s20 + $0xc] sm:$0xf] }
  0x12   : > { %v2685_v3 = vcombine.low %v2677_v0, %v2680_v1  ;;  %v435_v4 = vshrl.u32 %v2677_v0, 16  ;;  %v438_v5 = vshll.u32 %v2677_v0, 16  ;;  %v448_v6 = vshrl.u32 %v2680_v1, 16  ;;  %v220_v7 = vld [vmem:[%s2674_s20 + $0x10] sm:$0xf] }
  0x13   : > { %v2251_v8 = vcombine.low %v219_v2, %v220_v7  ;;  %v411_v9 = vshrl.u32 %v219_v2, 16  ;;  %v414_v10 = vshll.u32 %v219_v2, 16  ;;  %v420_v11 = vshll.u32 %v220_v7, 16  ;;  %v221_v12 = vld [vmem:[%s2674_s20 + $0x14] sm:$0x1] }
  0x14   : > { %1134 = vrot.lane.b32.xlu1 %v2685_v3, %s2627_s21  ;;  %v424_v14 = vshrl.u32 %v220_v7, 16  ;;  %369 = vst.msk [vmem:[#allocation2 + $0x10] sm:$0xff] %vm366_vm0, %v2685_v3  ;;  %v2283_v15 = vrot.slane %v219_v2, 9  ;;  %v911_v16 = vrot.slane %v220_v7, 5  ;;  %v914_v17 = vrot.slane %v221_v12, 5 }
  0x15   : > { %v2703_v18 = vld [vmem:[%s2674_s20] sm:$0xf]  ;;  %v413_v19 = vrot.slane %v411_v9, 4  ;;  %v416_v20 = vrot.slane %v414_v10, 5  ;;  %1132 = vrot.lane.b32.xlu0 %v2251_v8, %s2627_s21  ;;  %368 = vst.msk [vmem:[#allocation2 + $0x8] sm:$0xff] %vm366_vm0, %v2251_v8  ;;  %v2284_v45 = vrot.slane %v2677_v0, 9 }
  0x16   : > { %v2708_v21 = vld [vmem:[%s2674_s20 + $0x4] sm:$0xf]  ;;  %v218_v22 = vld [vmem:[%s2674_s20 + $0x8] sm:$0x1]  ;;  %v426_v23 = vrot.slane %v424_v14, 4  ;;  %v912_v24 = vsel %vm2694_vm5, %v2283_v15, %v911_v16  ;;  %v913_v25 = vrot.slane %v911_v16, 4 }
  0x17   : > { %v2282_v26 = vrot.slane %v2703_v18, 9  ;;  %v904_v27 = vrot.slane %v2708_v21, 5  ;;  %v907_v28 = vrot.slane %v218_v22, 5  ;;  %v387_v29 = vshrl.u32 %v2703_v18, 16  ;;  %v2722_v35 = vld [vmem:[%s2674_s20 + $0x20] sm:$0x1] }
  0x18   : > { %v390_v30 = vshll.u32 %v2703_v18, 16  ;;  %v915_v31 = vsel %vm2694_vm5, %v913_v25, %v914_v17  ;;  %v396_v32 = vshll.u32 %v2708_v21, 16  ;;  %v400_v33 = vshrl.u32 %v2708_v21, 16  ;;  %v2748_v7 = vld [vmem:[%s2674_s20 + $0x24] sm:$0xf] }
  0x19   : > { %v406_v34 = vshll.u32 %v218_v22, 16  ;;  %v2299_v36 = vcombine.low %v912_v24, %v915_v31  ;;  %v905_v37 = vsel %vm2694_vm5, %v2282_v26, %v904_v27  ;;  %v906_v38 = vrot.slane %v904_v27, 4  ;;  %v227_v24 = vld [vmem:[%s2674_s20 + $0x2c] sm:$0x1] }
  0x1a   : > { %v389_v39 = vrot.slane %v387_v29, 4  ;;  %v392_v40 = vrot.slane %v390_v30, 5  ;;  %v398_v41 = vrot.slane %v396_v32, 5  ;;  %v402_v42 = vrot.slane %v400_v33, 4 }
  0x1b   : > { %v408_v43 = vrot.slane %v406_v34, 5  ;;  %1300 = vrot.lane.b32.xlu0 %v2299_v36, %s2628_s22  ;;  %v908_v44 = vsel %vm2694_vm5, %v906_v38, %v907_v28  ;;  %v918_v46 = vrot.slane %v2680_v1, 5  ;;  %v921_v47 = vrot.slane %v2722_v35, 5 }
  0x1c   : > { %v2298_v48 = vcombine.low %v905_v37, %v908_v44  ;;  %v393_v49 = vor.u32 %v392_v40, %v389_v39  ;;  %v403_v50 = vor.u32 %v402_v42, %v398_v41  ;;  %v417_v51 = vor.u32 %v416_v20, %v413_v19  ;;  %v2606_v20 = vld [vmem:[%s3616_s1] sm:$0xff]   ;;  %v2793_v40 = vld [vmem:[%s2674_s20 + $0x30] sm:$0xf] }
  0x1d   : > { %v919_v53 = vsel %vm2694_vm5, %v2284_v45, %v918_v46  ;;  %v920_v54 = vrot.slane %v918_v46, 4  ;;  %v422_v55 = vrot.slane %v420_v11, 5  ;;  %v430_v56 = vshll.u32 %v221_v12, 16  ;;  %2526 = vmatprep.subr.bf16.mxu0 %v2606_v20  ;;  %2568 = vmatprep.subr.bf16.mxu1 %v2606_v20 }
  0x1e   : > { %1062 = vrot.lane.b32.xlu1 %v2298_v48, %s2629_s23  ;;  %v394_v57 = vrot.slane %v393_v49, 4  ;;  %v404_v58 = vrot.slane %v403_v50, 4  ;;  %v418_v59 = vrot.slane %v417_v51, 4  ;;  %v437_v60 = vrot.slane %v435_v4, 4  ;;  %2527 = vmatpush3.bf16.msra.mxu0 %v2606_v20 }
  0x1f   : > { %v922_v61 = vsel %vm2694_vm5, %v920_v54, %v921_v47  ;;  %v427_v62 = vor.u32 %v426_v23, %v422_v55  ;;  %v432_v63 = vrot.slane %v430_v56, 5  ;;  %v440_v2 = vrot.slane %v438_v5, 5  ;;  %v2760_v5 = vld [vmem:[%s2674_s20 + $0x28] sm:$0xf]  ;;  %2573 = vmatpush3.bf16.msra.mxu1 %v2606_v20  ;;  %v2609_v47 = vld [vmem:[%s3616_s1 + $0x10] sm:$0xff]  }
  0x20   : > { %v399_v8 = vsel %vm2734_vm6, %v394_v57, %v398_v41  ;;  %v409_v9 = vsel %vm2734_vm6, %v404_v58, %v408_v43  ;;  %v2754_v10 = vcombine.low %v919_v53, %v922_v61  ;;  %v423_v4 = vsel %vm2734_vm6, %v418_v59, %v422_v55  ;;  %v2796_v41 = vld [vmem:[%s2674_s20 + $0x34] sm:$0xf]  ;;  %v2818_v56 = vld [vmem:[%s2674_s20 + $0x38] sm:$0x1]  ;;  %v2821_v57 = vld [vmem:[%s2674_s20 + $0x3c] sm:$0xf] }
  0x21   : > { %v2266_v11 = vcombine.low %v399_v8, %v409_v9  ;;  %v428_v12 = vrot.slane %v427_v62, 4  ;;  %v441_v14 = vor.u32 %v440_v2, %v437_v60  ;;  %v444_v0 = vshll.u32 %v2680_v1, 16  ;;  %v2830_v62 = vld [vmem:[%s2674_s20 + $0x40] sm:$0xf] }
  0x22   : > { %1064 = vrot.lane.b32.xlu1 %v2299_v36, %s2629_s23  ;;  %v450_v15 = vrot.slane %v448_v6, 4  ;;  %v454_v16 = vshll.u32 %v2722_v35, 16  ;;  %v2768_v17 = vcombine.low %v2748_v7, %v2760_v5  ;;  %v459_v19 = vshrl.u32 %v2748_v7, 16  ;;  %v2608_v35 = vld [vmem:[%s3616_s1 + $0x8] sm:$0xff]  }
  0x23   : > { %818 = vrot.lane.b32.xlu0 %v2266_v11, %s2630_s26  ;;  %v433_v22 = vsel %vm2734_vm6, %v428_v12, %v432_v63  ;;  %v442_v1 = vrot.slane %v441_v14, 4  ;;  %v446_v6 = vrot.slane %v444_v0, 5  ;;  %v462_v23 = vshll.u32 %v2748_v7, 16  ;;  %2528 = vmatprep.subr.bf16.mxu0 %v2608_v35  ;;  %v2610_v63 = vld [vmem:[%s3616_s1 + $0x18] sm:$0xff]  }
  0x24   : > { %v2267_v25 = vcombine.low %v423_v4, %v433_v22  ;;  %v472_v26 = vshrl.u32 %v2760_v5, 16  ;;  %370 = vst.msk [vmem:[#allocation2 + $0x18] sm:$0xff] %vm366_vm0, %v2768_v17  ;;  %v461_v27 = vrot.slane %v459_v19, 4  ;;  %v456_v29 = vrot.slane %v454_v16, 5  ;;  %2569 = vmatprep.subr.bf16.mxu1 %v2608_v35  ;;  %2529 = vmatpush3.bf16.msra.mxu0 %v2608_v35  ;;  %v2858_v16 = vld [vmem:[%s2674_s20 + $0x44] sm:$0x1] }
  0x25   : > { %v451_v28 = vor.u32 %v450_v15, %v446_v6  ;;  %v464_v30 = vrot.slane %v462_v23, 5  ;;  %v468_v31 = vshll.u32 %v2760_v5, 16  ;;  %v478_v33 = vshll.u32 %v227_v24, 16  ;;  %2574 = vmatpush3.bf16.msra.mxu1 %v2608_v35  ;;  %2530 = vmatprep.subr.bf16.mxu0 %v2609_v47  ;;  %v2864_v23 = vld [vmem:[%s2674_s20 + $0x48] sm:$0xf] }
  0x26   : > { %1302 = vrot.lane.b32.xlu1 %v2754_v10, %s2628_s22  ;;  %v474_v32 = vrot.slane %v472_v26, 4  ;;  %v925_v34 = vrot.slane %v2760_v5, 5  ;;  %v447_v36 = vsel %vm2734_vm6, %v442_v1, %v446_v6  ;;  %v2800_v42 = vcombine.low %v2793_v40, %v2796_v41  ;;  %2570 = vmatprep.subr.bf16.mxu1 %v2609_v47  ;;  %v2888_v35 = vld [vmem:[%s2674_s20 + $0x50] sm:$0x1] }
  0x27   : > { %820 = vrot.lane.b32.xlu0 %v2267_v25, %s2630_s26  ;;  %v452_v37 = vrot.slane %v451_v28, 4  ;;  %v465_v38 = vor.u32 %v464_v30, %v461_v27  ;;  %v470_v39 = vrot.slane %v468_v31, 5  ;;  %v480_v46 = vrot.slane %v478_v33, 5  ;;  %v2878_v30 = vld [vmem:[%s2674_s20 + $0x4c] sm:$0xf] }
  0x28   : > { %v2285_v49 = vrot.slane %v2748_v7, 9  ;;  %v927_v50 = vrot.slane %v925_v34, 4  ;;  %v928_v51 = vrot.slane %v227_v24, 5  ;;  %371 = vst.msk [vmem:[#allocation2 + $0x20] sm:$0xff] %vm366_vm0, %v2800_v42  ;;  %v483_v54 = vshrl.u32 %v2793_v40, 16  ;;  %2531 = vmatpush3.bf16.msra.mxu0 %v2609_v47 }
  0x29   : > { %v457_v43 = vsel %vm2734_vm6, %v452_v37, %v456_v29  ;;  %v466_v44 = vrot.slane %v465_v38, 4  ;;  %v475_v45 = vor.u32 %v474_v32, %v470_v39  ;;  %v486_v55 = vshll.u32 %v2793_v40, 16  ;;  %2575 = vmatpush3.bf16.msra.mxu1 %v2609_v47  ;;  %2532 = vmatprep.subr.bf16.mxu0 %v2610_v63 }
  0x2a   : > { %v2807_v48 = vcombine.low %v447_v36, %v457_v43  ;;  %v496_v60 = vshrl.u32 %v2796_v41, 16  ;;  %v492_v61 = vshll.u32 %v2796_v41, 16  ;;  %v926_v2 = vsel %vm2694_vm5, %v2285_v49, %v925_v34  ;;  %2571 = vmatprep.subr.bf16.mxu1 %v2610_v63 }
  0x2b   : > { %1224 = vrot.lane.b32.xlu0 %v2267_v25, %s2631_s5  ;;  %v476_v53 = vrot.slane %v475_v45, 4  ;;  %v471_v58 = vsel %vm2734_vm6, %v466_v44, %v470_v39  ;;  %v929_v7 = vsel %vm2694_vm5, %v927_v50, %v928_v51  ;;  %v485_v8 = vrot.slane %v483_v54, 4 }
  0x2c   : > { %1226 = vrot.lane.b32.xlu1 %v2807_v48, %s2631_s5  ;;  %v488_v9 = vrot.slane %v486_v55, 5  ;;  %v2843_v4 = vcombine.low %v2821_v57, %v2830_v62  ;;  %v507_v11 = vshrl.u32 %v2821_v57, 16  ;;  %v502_v14 = vshll.u32 %v2818_v56, 16  ;;  %2533 = vmatpush3.bf16.msra.mxu0 %v2610_v63  ;;  %v2907_v55 = vld [vmem:[%s2674_s20 + $0x54] sm:$0xf] }
  0x2d   : > { %v481_v59 = vsel %vm2734_vm6, %v476_v53, %v480_v46  ;;  %v510_v0 = vshll.u32 %v2821_v57, 16  ;;  %v2853_v5 = vrot.slane %v492_v61, 5  ;;  %v498_v15 = vrot.slane %v496_v60, 4  ;;  %2576 = vmatpush3.bf16.msra.mxu1 %v2610_v63  ;;  %v2912_v61 = vld [vmem:[%s2674_s20 + $0x58] sm:$0xf] }
  0x2e   : > { %v2848_v12 = vcombine.low %v471_v58, %v481_v59  ;;  %372 = vst.msk [vmem:[#allocation2 + $0x28] sm:$0xff] %vm366_vm0, %v2843_v4  ;;  %v516_v19 = vshll.u32 %v2830_v62, 16  ;;  %v2286_v20 = vrot.slane %v2793_v40, 9  ;;  %v932_v22 = vrot.slane %v2796_v41, 5 }
  0x2f   : > { %1370 = vrot.lane.b32.xlu0 %v2685_v3, %s2632_s8  ;;  %v520_v3 = vshrl.u32 %v2830_v62, 16  ;;  %v509_v1 = vrot.slane %v507_v11, 4  ;;  %v512_v6 = vrot.slane %v510_v0, 5  ;;  %v2868_v24 = vcombine.low %v926_v2, %v929_v7 }
  0x30   : > { %1372 = vrot.lane.b32.xlu1 %v2768_v17, %s2632_s8  ;;  %v935_v25 = vrot.slane %v2818_v56, 5  ;;  %v489_v26 = vor.u32 %v488_v9, %v485_v8  ;;  %v2873_v27 = vrot.slane %v502_v14, 5  ;;  %v2875_v28 = vrot.slane %v516_v19, 5 }
  0x31   : > { %v522_v29 = vrot.slane %v520_v3, 4  ;;  %v499_v31 = vor.u32 %v498_v15, %v2853_v5  ;;  %v526_v32 = vshll.u32 %v2858_v16, 16  ;;  %v2884_v33 = vcombine.low %v2864_v23, %v2878_v30 }
  0x32   : > { %v531_v34 = vshrl.u32 %v2864_v23, 16  ;;  %v2892_v36 = vsel %vm2694_vm5, %v2286_v20, %v932_v22  ;;  %v934_v37 = vrot.slane %v932_v22, 4  ;;  %v513_v38 = vor.u32 %v512_v6, %v509_v1  ;;  %v2942_v6 = vld [vmem:[%s2674_s20 + $0x5c] sm:$0x1] }
  0x33   : > { %1462 = vrot.lane.b32.xlu0 %v2807_v48, %s2633_s9  ;;  %v534_v39 = vshll.u32 %v2864_v23, 16  ;;  %v939_v40 = vrot.slane %v2830_v62, 5  ;;  %v544_v41 = vshrl.u32 %v2878_v30, 16  ;;  %373 = vst.msk [vmem:[#allocation2 + $0x30] sm:$0xff] %vm366_vm0, %v2884_v33  ;;  %v540_v44 = vshll.u32 %v2878_v30, 16 }
  0x34   : > { %1464 = vrot.lane.b32.xlu1 %v2848_v12, %s2633_s9  ;;  %v533_v43 = vrot.slane %v531_v34, 4  ;;  %v490_v45 = vrot.slane %v489_v26, 4  ;;  %v523_v46 = vor.u32 %v522_v29, %v2875_v28  ;;  %v550_v49 = vshll.u32 %v2888_v35, 16  ;;  %v2965_v34 = vld [vmem:[%s2674_s20 + $0x64] sm:$0xf] }
  0x35   : > { %v536_v47 = vrot.slane %v534_v39, 5  ;;  %v500_v50 = vrot.slane %v499_v31, 4  ;;  %v528_v51 = vrot.slane %v526_v32, 5  ;;  %v542_v53 = vrot.slane %v540_v44, 5 }
  0x36   : > { %v546_v54 = vrot.slane %v544_v41, 4  ;;  %v514_v56 = vrot.slane %v513_v38, 4  ;;  %v2287_v58 = vrot.slane %v2821_v57, 9  ;;  %v942_v59 = vrot.slane %v2858_v16, 5 }
  0x37   : > { %1538 = vrot.lane.b32.xlu0 %v2754_v10, %s2634_s10  ;;  %v537_v60 = vor.u32 %v536_v47, %v533_v43  ;;  %v946_v63 = vrot.slane %v2878_v30, 5  ;;  %v2919_v2 = vcombine.low %v2907_v55, %v2912_v61  ;;  %v524_v57 = vrot.slane %v523_v46, 4 }
  0x38   : > { %822 = vrot.lane.b32.xlu1 %v2807_v48, %s2630_s26  ;;  %v941_v48 = vrot.slane %v939_v40, 4  ;;  %v547_v62 = vor.u32 %v546_v54, %v542_v53  ;;  %v552_v7 = vrot.slane %v550_v49, 5  ;;  %v555_v8 = vshrl.u32 %v2907_v55, 16  ;;  %v2997_v49 = vld [vmem:[%s2674_s20 + $0x68] sm:$0x1] }
  0x39   : > { %v558_v9 = vshll.u32 %v2907_v55, 16  ;;  %v538_v11 = vrot.slane %v537_v60, 4  ;;  %v2288_v0 = vrot.slane %v2864_v23, 9  ;;  %v568_v3 = vshrl.u32 %v2912_v61, 16  ;;  %374 = vst.msk [vmem:[#allocation2 + $0x38] sm:$0xff] %vm366_vm0, %v2919_v2 }
  0x3a   : > { %v548_v14 = vrot.slane %v547_v62, 4  ;;  %v936_v15 = vsel %vm2694_vm5, %v934_v37, %v935_v25  ;;  %v948_v16 = vrot.slane %v946_v63, 4  ;;  %v949_v19 = vrot.slane %v2888_v35, 5 }
  0x3b   : > { %1540 = vrot.lane.b32.xlu0 %v2868_v24, %s2634_s10  ;;  %v564_v20 = vshll.u32 %v2912_v61, 16  ;;  %v495_v22 = vsel %vm2734_vm6, %v490_v45, %v2853_v5  ;;  %v505_v1 = vsel %vm2734_vm6, %v500_v50, %v2873_v27  ;;  %v557_v23 = vrot.slane %v555_v8, 4  ;;  %v243_v50 = vld [vmem:[%s2674_s20 + $0x6c] sm:$0xf] }
  0x3c   : > { %824 = vrot.lane.b32.xlu1 %v2848_v12, %s2630_s26  ;;  %v560_v25 = vrot.slane %v558_v9, 5  ;;  %v529_v26 = vsel %vm2734_vm6, %v524_v57, %v528_v51  ;;  %v940_v5 = vsel %vm2694_vm5, %v2287_v58, %v939_v40  ;;  %v943_v27 = vsel %vm2694_vm5, %v941_v48, %v942_v59  ;;  %v245_v57 = vld [vmem:[%s2674_s20 + $0x74] sm:$0x1] }
  0x3d   : > { %v543_v29 = vsel %vm2734_vm6, %v538_v11, %v542_v53  ;;  %v553_v30 = vsel %vm2734_vm6, %v548_v14, %v552_v7  ;;  %v947_v31 = vsel %vm2694_vm5, %v2288_v0, %v946_v63  ;;  %v570_v32 = vrot.slane %v568_v3, 4 }
  0x3e   : > { %v950_v35 = vsel %vm2694_vm5, %v948_v16, %v949_v19  ;;  %v2969_v37 = vrot.slane %v564_v20, 5  ;;  %v574_v38 = vshll.u32 %v2942_v6, 16  ;;  %v561_v40 = vor.u32 %v560_v25, %v557_v23 }
  0x3f   : > { %1066 = vrot.lane.b32.xlu0 %v2754_v10, %s2629_s23  ;;  %v519_v10 = vsel %vm2734_vm6, %v514_v56, %v2875_v28  ;;  %v2962_v28 = vld [vmem:[%s2674_s20 + $0x60] sm:$0xf]  ;;  %v2980_v41 = vcombine.low %v495_v22, %v505_v1  ;;  %v2983_v43 = vcombine.low %v2892_v36, %v936_v15  ;;  %v2985_v44 = vcombine.low %v940_v5, %v943_v27  ;;  %v244_v56 = vld [vmem:[%s2674_s20 + $0x70] sm:$0xf] }
  0x40   : > { %1068 = vrot.lane.b32.xlu1 %v2868_v24, %s2629_s23  ;;  %v2974_v39 = vcombine.low %v2962_v28, %v2965_v34  ;;  %v2989_v45 = vcombine.low %v519_v10, %v529_v26  ;;  %v2991_v46 = vcombine.low %v543_v29, %v553_v30  ;;  %v2289_v47 = vrot.slane %v2907_v55, 9 }
  0x41   : > { %v571_v36 = vor.u32 %v570_v32, %v2969_v37  ;;  %v3001_v51 = vrot.slane %v574_v38, 5  ;;  %v953_v53 = vrot.slane %v2912_v61, 5  ;;  %v956_v54 = vrot.slane %v2942_v6, 5  ;;  %v247_v38 = vld [vmem:[%s2674_s20 + $0x7c] sm:$0xf] }
  0x42   : > { %375 = vst.msk [vmem:[#allocation2 + $0x40] sm:$0xff] %vm366_vm0, %v2974_v39  ;;  %v3008_v58 = vrot.slane %v561_v40, 4  ;;  %v2290_v55 = vrot.slane %v2962_v28, 9  ;;  %v960_v59 = vrot.slane %v2965_v34, 5  ;;  %v963_v60 = vrot.slane %v2997_v49, 5 }
  0x43   : > { %1136 = vrot.lane.b32.xlu0 %v2768_v17, %s2627_s21  ;;  %v2993_v17 = vcombine.low %v947_v31, %v950_v35  ;;  %v579_v48 = vshrl.u32 %v2962_v28, 16  ;;  %v582_v61 = vshll.u32 %v2962_v28, 16  ;;  %v3017_v62 = vcombine.low %v243_v50, %v244_v56  ;;  %v246_v31 = vld [vmem:[%s2674_s20 + $0x78] sm:$0xf] }
  0x44   : > { %1138 = vrot.lane.b32.xlu1 %v2800_v42, %s2627_s21  ;;  %v603_v63 = vshrl.u32 %v243_v50, 16  ;;  %v962_v7 = vrot.slane %v960_v59, 4  ;;  %v606_v8 = vshll.u32 %v243_v50, 16  ;;  %v616_v9 = vshrl.u32 %v244_v56, 16 }
  0x45   : > { %v572_v11 = vrot.slane %v571_v36, 4  ;;  %v3024_v14 = vsel %vm2694_vm5, %v2289_v47, %v953_v53  ;;  %376 = vst.msk [vmem:[#allocation2 + $0x48] sm:$0xff] %vm366_vm0, %v3017_v62  ;;  %v612_v3 = vshll.u32 %v244_v56, 16  ;;  %v622_v20 = vshll.u32 %v245_v57, 16 }
  0x46   : > { %v605_v0 = vrot.slane %v603_v63, 4  ;;  %v964_v15 = vsel %vm2694_vm5, %v962_v7, %v963_v60  ;;  %v608_v16 = vrot.slane %v606_v8, 5  ;;  %v618_v19 = vrot.slane %v616_v9, 4  ;;  %v250_v8 = vld [vmem:[%s2674_s20 + $0x88] sm:$0xf] }
  0x47   : > { %1228 = vrot.lane.b32.xlu0 %v2848_v12, %s2631_s5  ;;  %v961_v12 = vsel %vm2694_vm5, %v2290_v55, %v960_v59  ;;  %v955_v22 = vrot.slane %v953_v53, 4  ;;  %v592_v1 = vshrl.u32 %v2965_v34, 16  ;;  %v614_v23 = vrot.slane %v612_v3, 5  ;;  %v248_v53 = vld [vmem:[%s2674_s20 + $0x80] sm:$0x1] }
  0x48   : > { %1230 = vrot.lane.b32.xlu1 %v2980_v41, %s2631_s5  ;;  %v3035_v6 = vcombine.low %v961_v12, %v964_v15  ;;  %v3041_v25 = vrot.slane %v579_v48, 4  ;;  %v609_v10 = vor.u32 %v608_v16, %v605_v0  ;;  %v624_v26 = vrot.slane %v622_v20, 5  ;;  %v2612_v15 = vld [vmem:[%s3616_s1 + $0x20] ss:$0 sps:$4 sm:$0xff]  }
  0x49   : > { %v619_v5 = vor.u32 %v618_v19, %v614_v23  ;;  %v2250_v27 = vcombine.low %v2703_v18, %v2708_v21  ;;  %v2291_v29 = vrot.slane %v243_v50, 9  ;;  %v967_v30 = vrot.slane %v244_v56, 5  ;;  %2578 = vmatprep.subr.msk.bf16.mxu0 %vm1704_vm7, %v2612_v15  ;;  %2579 = vmatprep.subr.msk.bf16.mxu1 %vm1704_vm7, %v2612_v15 }
  0x4a   : > { %v3048_v32 = vrot.slane %v582_v61, 5  ;;  %v588_v28 = vshll.u32 %v2965_v34, 16  ;;  %v610_v35 = vrot.slane %v609_v10, 4  ;;  %v577_v18 = vsel %vm2734_vm6, %v572_v11, %v3001_v51  ;;  %v249_v61 = vld [vmem:[%s2674_s20 + $0x84] sm:$0xf] }
  0x4b   : > { %1304 = vrot.lane.b32.xlu0 %v2868_v24, %s2628_s22  ;;  %v567_v24 = vsel %vm2734_vm6, %v3008_v58, %v2969_v37  ;;  %v970_v37 = vrot.slane %v245_v57, 5  ;;  %v620_v21 = vrot.slane %v619_v5, 4  ;;  %367 = vst.msk [vmem:[#allocation2] sm:$0xff] %vm366_vm0, %v2250_v27  ;;  %v969_v40 = vrot.slane %v967_v30, 4 }
  0x4c   : > { %1306 = vrot.lane.b32.xlu1 %v2983_v43, %s2628_s22  ;;  %v3062_v34 = vsel %vm2694_vm5, %v955_v22, %v956_v54  ;;  %v615_v47 = vsel %vm2734_vm6, %v610_v35, %v614_v23  ;;  %v3066_v50 = vcombine.low %v246_v31, %v247_v38  ;;  %v627_v36 = vshrl.u32 %v246_v31, 16 }
  0x4d   : > { %v625_v51 = vsel %vm2734_vm6, %v620_v21, %v624_v26  ;;  %v971_v56 = vsel %vm2694_vm5, %v969_v40, %v970_v37  ;;  %v630_v58 = vshll.u32 %v246_v31, 16  ;;  %v640_v55 = vshrl.u32 %v247_v38, 16 }
  0x4e   : > { %v3075_v54 = vrot.slane %v592_v1, 4  ;;  %v3077_v59 = vcombine.low %v615_v47, %v625_v51  ;;  %377 = vst.msk [vmem:[#allocation2 + $0x50] sm:$0xff] %vm366_vm0, %v3066_v50  ;;  %v629_v48 = vrot.slane %v627_v36, 4  ;;  %v636_v57 = vshll.u32 %v247_v38, 16  ;;  %v252_v36 = vld [vmem:[%s2674_s20 + $0x90] sm:$0xf] }
  0x4f   : > { %1374 = vrot.lane.b32.xlu0 %v2800_v42, %s2632_s8  ;;  %v968_v42 = vsel %vm2694_vm5, %v2291_v29, %v967_v30  ;;  %v632_v63 = vrot.slane %v630_v58, 5  ;;  %v642_v12 = vrot.slane %v640_v55, 4  ;;  %v646_v7 = vshll.u32 %v248_v53, 16  ;;  %v251_v29 = vld [vmem:[%s2674_s20 + $0x8c] sm:$0x1] }
  0x50   : > { %1376 = vrot.lane.b32.xlu1 %v2843_v4, %s2632_s8  ;;  %v3079_v60 = vcombine.low %v968_v42, %v971_v56  ;;  %v3087_v9 = vcombine.low %v567_v24, %v577_v18  ;;  %v2292_v11 = vrot.slane %v246_v31, 9  ;;  %v974_v0 = vrot.slane %v247_v38, 5  ;;  %v253_v55 = vld [vmem:[%s2674_s20 + $0x94] sm:$0xf] }
  0x51   : > { %v977_v3 = vrot.slane %v248_v53, 5  ;;  %v633_v16 = vor.u32 %v632_v63, %v629_v48  ;;  %v638_v19 = vrot.slane %v636_v57, 5  ;;  %v648_v20 = vrot.slane %v646_v7, 5  ;;  %v254_v7 = vld [vmem:[%s2674_s20 + $0x98] sm:$0x1] }
  0x52   : > { %v3092_v22 = vcombine.low %v249_v61, %v250_v8  ;;  %v975_v1 = vsel %vm2694_vm5, %v2292_v11, %v974_v0  ;;  %v976_v23 = vrot.slane %v974_v0, 4  ;;  %v651_v24 = vshrl.u32 %v249_v61, 16 }
  0x53   : > { %1466 = vrot.lane.b32.xlu0 %v2980_v41, %s2633_s9  ;;  %v654_v10 = vshll.u32 %v249_v61, 16  ;;  %v634_v26 = vrot.slane %v633_v16, 4  ;;  %v643_v5 = vor.u32 %v642_v12, %v638_v19  ;;  %v664_v27 = vshrl.u32 %v250_v8, 16 }
  0x54   : > { %1468 = vrot.lane.b32.xlu1 %v2989_v45, %s2633_s9  ;;  %378 = vst.msk [vmem:[#allocation2 + $0x58] sm:$0xff] %vm366_vm0, %v3092_v22  ;;  %v3103_v30 = vrot.slane %v588_v28, 5  ;;  %v978_v31 = vsel %vm2694_vm5, %v976_v23, %v977_v3  ;;  %v1706_v35 = vsel %vm1704_vm7, %v2612_v15, 0  ;;  %v653_v37 = vrot.slane %v651_v24, 4 }
  0x55   : > { %v644_v38 = vrot.slane %v643_v5, 4  ;;  %v3109_v18 = vcombine.low %v975_v1, %v978_v31  ;;  %2535 = vmatpush3.bf16.msra.mxu0 %v1706_v35  ;;  %v656_v21 = vrot.slane %v654_v10, 5  ;;  %2577 = vmatpush3.bf16.msra.mxu1 %v1706_v35  ;;  %v660_v28 = vshll.u32 %v250_v8, 16 }
  0x56   : > { %v666_v42 = vrot.slane %v664_v27, 4  ;;  %v670_v40 = vshll.u32 %v251_v29, 16  ;;  %v2293_v47 = vrot.slane %v249_v61, 9  ;;  %v981_v56 = vrot.slane %v250_v8, 5  ;;  %v255_v27 = vld [vmem:[%s2674_s20 + $0x9c] sm:$0xf] }
  0x57   : > { %1542 = vrot.lane.b32.xlu0 %v2983_v43, %s2634_s10  ;;  %v649_v53 = vsel %vm2734_vm6, %v644_v38, %v648_v20  ;;  %v657_v51 = vor.u32 %v656_v21, %v653_v37  ;;  %v984_v58 = vrot.slane %v251_v29, 5  ;;  %v662_v63 = vrot.slane %v660_v28, 5 }
  0x58   : > { %826 = vrot.lane.b32.xlu1 %v2980_v41, %s2630_s26  ;;  %v639_v41 = vsel %vm2734_vm6, %v634_v26, %v638_v19  ;;  %v672_v57 = vrot.slane %v670_v40, 5  ;;  %v3121_v12 = vcombine.low %v252_v36, %v253_v55  ;;  %v982_v61 = vsel %vm2694_vm5, %v2293_v47, %v981_v56  ;;  %v257_v40 = vld [vmem:[%s2674_s20 + $0xa4] sm:$0x1] }
  0x59   : > { %v3119_v48 = vcombine.low %v639_v41, %v649_v53  ;;  %v658_v11 = vrot.slane %v657_v51, 4  ;;  %v983_v0 = vrot.slane %v981_v56, 4  ;;  %v675_v3 = vshrl.u32 %v252_v36, 16  ;;  %v256_v41 = vld [vmem:[%s2674_s20 + $0xa0] sm:$0xf] }
  0x5a   : > { %v667_v8 = vor.u32 %v666_v42, %v662_v63  ;;  %v678_v15 = vshll.u32 %v252_v36, 16  ;;  %v688_v16 = vshrl.u32 %v253_v55, 16  ;;  %379 = vst.msk [vmem:[#allocation2 + $0x60] sm:$0xff] %vm366_vm0, %v3121_v12  ;;  %v684_v19 = vshll.u32 %v253_v55, 16 }
  0x5b   : > { %1544 = vrot.lane.b32.xlu0 %v2985_v44, %s2634_s10  ;;  %v663_v20 = vsel %vm2734_vm6, %v658_v11, %v662_v63  ;;  %v985_v1 = vsel %vm2694_vm5, %v983_v0, %v984_v58  ;;  %v677_v23 = vrot.slane %v675_v3, 4  ;;  %v694_v24 = vshll.u32 %v254_v7, 16 }
  0x5c   : > { %828 = vrot.lane.b32.xlu1 %v2989_v45, %s2630_s26  ;;  %v3136_v10 = vcombine.low %v982_v61, %v985_v1  ;;  %v680_v26 = vrot.slane %v678_v15, 5  ;;  %v686_v5 = vrot.slane %v684_v19, 5  ;;  %v690_v29 = vrot.slane %v688_v16, 4  ;;  %v258_v15 = vld [vmem:[%s2674_s20 + $0xa8] sm:$0xf] }
  0x5d   : > { %v696_v31 = vrot.slane %v694_v24, 5  ;;  %v2294_v35 = vrot.slane %v252_v36, 9  ;;  %v988_v37 = vrot.slane %v253_v55, 5  ;;  %v991_v28 = vrot.slane %v254_v7, 5 }
  0x5e   : > { %v681_v21 = vor.u32 %v680_v26, %v677_v23  ;;  %v3144_v42 = vcombine.low %v255_v27, %v256_v41  ;;  %v691_v53 = vor.u32 %v690_v29, %v686_v5  ;;  %v699_v56 = vshrl.u32 %v255_v27, 16  ;;  %v259_v26 = vld [vmem:[%s2674_s20 + $0xac] sm:$0xf] }
  0x5f   : > { %1070 = vrot.lane.b32.xlu0 %v2983_v43, %s2629_s23  ;;  %v668_v43 = vrot.slane %v667_v8, 4  ;;  %v989_v36 = vsel %vm2694_vm5, %v2294_v35, %v988_v37  ;;  %v990_v51 = vrot.slane %v988_v37, 4  ;;  %v702_v58 = vshll.u32 %v255_v27, 16 }
  0x60   : > { %1072 = vrot.lane.b32.xlu1 %v2985_v44, %s2629_s23  ;;  %v712_v55 = vshrl.u32 %v256_v41, 16  ;;  %380 = vst.msk [vmem:[#allocation2 + $0x68] sm:$0xff] %vm366_vm0, %v3144_v42  ;;  %v692_v63 = vrot.slane %v691_v53, 4  ;;  %v708_v7 = vshll.u32 %v256_v41, 16  ;;  %v718_v11 = vshll.u32 %v257_v40, 16 }
  0x61   : > { %v673_v38 = vsel %vm2734_vm6, %v668_v43, %v672_v57  ;;  %v992_v57 = vsel %vm2694_vm5, %v990_v51, %v991_v28  ;;  %v701_v3 = vrot.slane %v699_v56, 4  ;;  %v704_v8 = vrot.slane %v702_v58, 5 }
  0x62   : > { %v3149_v47 = vcombine.low %v663_v20, %v673_v38  ;;  %v3161_v0 = vcombine.low %v989_v36, %v992_v57  ;;  %v697_v16 = vsel %vm2734_vm6, %v692_v63, %v696_v31  ;;  %v710_v19 = vrot.slane %v708_v7, 5  ;;  %v260_v38 = vld [vmem:[%s2674_s20 + $0xb0] sm:$0x1]  ;;  %v261_v7 = vld [vmem:[%s2674_s20 + $0xb4] sm:$0xf] }
  0x63   : > { %1140 = vrot.lane.b32.xlu0 %v2843_v4, %s2627_s21  ;;  %v682_v4 = vrot.slane %v681_v21, 4  ;;  %v714_v20 = vrot.slane %v712_v55, 4  ;;  %v720_v1 = vrot.slane %v718_v11, 5  ;;  %v2295_v24 = vrot.slane %v255_v27, 9  ;;  %v262_v11 = vld [vmem:[%s2674_s20 + $0xb8] sm:$0xf] }
  0x64   : > { %1142 = vrot.lane.b32.xlu1 %v2884_v33, %s2627_s21  ;;  %v995_v43 = vrot.slane %v256_v41, 5  ;;  %v998_v29 = vrot.slane %v257_v40, 5  ;;  %v3171_v35 = vcombine.low %v258_v15, %v259_v26  ;;  %v723_v37 = vshrl.u32 %v258_v15, 16 }
  0x65   : > { %v687_v61 = vsel %vm2734_vm6, %v682_v4, %v686_v5  ;;  %v715_v5 = vor.u32 %v714_v20, %v710_v19  ;;  %v726_v53 = vshll.u32 %v258_v15, 16  ;;  %v736_v41 = vshrl.u32 %v259_v26, 16 }
  0x66   : > { %v3168_v23 = vcombine.low %v687_v61, %v697_v16  ;;  %v996_v31 = vsel %vm2694_vm5, %v2295_v24, %v995_v43  ;;  %v997_v28 = vrot.slane %v995_v43, 4  ;;  %381 = vst.msk [vmem:[#allocation2 + $0x70] sm:$0xff] %vm366_vm0, %v3171_v35  ;;  %v725_v40 = vrot.slane %v723_v37, 4  ;;  %v263_v37 = vld [vmem:[%s2674_s20 + $0xbc] sm:$0x1] }
  0x67   : > { %1232 = vrot.lane.b32.xlu0 %v2989_v45, %s2631_s5  ;;  %v705_v45 = vor.u32 %v704_v8, %v701_v3  ;;  %v716_v27 = vrot.slane %v715_v5, 4  ;;  %v732_v36 = vshll.u32 %v259_v26, 16  ;;  %v728_v4 = vrot.slane %v726_v53, 5 }
  0x68   : > { %1234 = vrot.lane.b32.xlu1 %v2991_v46, %s2631_s5  ;;  %v999_v51 = vsel %vm2694_vm5, %v997_v28, %v998_v29  ;;  %v742_v56 = vshll.u32 %v260_v38, 16  ;;  %v738_v57 = vrot.slane %v736_v41, 4  ;;  %v2296_v16 = vrot.slane %v258_v15, 9 }
  0x69   : > { %v706_v21 = vrot.slane %v705_v45, 4  ;;  %v721_v58 = vsel %vm2734_vm6, %v716_v27, %v720_v1  ;;  %v3188_v55 = vcombine.low %v996_v31, %v999_v51  ;;  %v734_v63 = vrot.slane %v732_v36, 5 }
  0x6a   : > { %v729_v3 = vor.u32 %v728_v4, %v725_v40  ;;  %v744_v8 = vrot.slane %v742_v56, 5  ;;  %v1002_v20 = vrot.slane %v259_v26, 5  ;;  %v1005_v1 = vrot.slane %v260_v38, 5 }
  0x6b   : > { %1308 = vrot.lane.b32.xlu0 %v2985_v44, %s2628_s22  ;;  %v711_v44 = vsel %vm2734_vm6, %v706_v21, %v710_v19  ;;  %v739_v19 = vor.u32 %v738_v57, %v734_v63  ;;  %v3198_v45 = vcombine.low %v261_v7, %v262_v11  ;;  %v747_v43 = vshrl.u32 %v261_v7, 16 }
  0x6c   : > { %1310 = vrot.lane.b32.xlu1 %v2993_v17, %s2628_s22  ;;  %v3194_v61 = vcombine.low %v711_v44, %v721_v58  ;;  %v730_v24 = vrot.slane %v729_v3, 4  ;;  %v750_v5 = vshll.u32 %v261_v7, 16  ;;  %v760_v29 = vshrl.u32 %v262_v11, 16 }
  0x6d   : > { %v740_v21 = vrot.slane %v739_v19, 4  ;;  %v1004_v31 = vrot.slane %v1002_v20, 4  ;;  %382 = vst.msk [vmem:[#allocation2 + $0x78] sm:$0xff] %vm366_vm0, %v3198_v45  ;;  %v756_v15 = vshll.u32 %v262_v11, 16  ;;  %v749_v38 = vrot.slane %v747_v43, 4 }
  0x6e   : > { %v735_v26 = vsel %vm2734_vm6, %v730_v24, %v734_v63  ;;  %v752_v28 = vrot.slane %v750_v5, 5  ;;  %v762_v53 = vrot.slane %v760_v29, 4  ;;  %v766_v36 = vshll.u32 %v263_v37, 16 }
  0x6f   : > { %1378 = vrot.lane.b32.xlu0 %v2884_v33, %s2632_s8  ;;  %v1003_v33 = vsel %vm2694_vm5, %v2296_v16, %v1002_v20  ;;  %v745_v27 = vsel %vm2734_vm6, %v740_v21, %v744_v8  ;;  %v1006_v41 = vsel %vm2694_vm5, %v1004_v31, %v1005_v1  ;;  %v758_v40 = vrot.slane %v756_v15, 5 }
  0x70   : > { %1380 = vrot.lane.b32.xlu1 %v2919_v2, %s2632_s8  ;;  %v3215_v44 = vcombine.low %v735_v26, %v745_v27  ;;  %v3217_v51 = vcombine.low %v1003_v33, %v1006_v41  ;;  %v753_v4 = vor.u32 %v752_v28, %v749_v38  ;;  %v1009_v56 = vrot.slane %v262_v11, 5 }
  0x71   : > { %v2305_v58 = vcombine.low %v3024_v14, %v3062_v34  ;;  %v763_v63 = vor.u32 %v762_v53, %v758_v40  ;;  %v768_v57 = vrot.slane %v766_v36, 5  ;;  %v2297_v8 = vrot.slane %v261_v7, 9 }
  0x72   : > { %v754_v3 = vrot.slane %v753_v4, 4  ;;  %v1011_v16 = vrot.slane %v1009_v56, 4  ;;  %v1012_v19 = vrot.slane %v263_v37, 5  ;;  %v585_v20 = vor.u32 %v3048_v32, %v3041_v25 }
  0x73   : > { %1470 = vrot.lane.b32.xlu0 %v2991_v46, %s2633_s9  ;;  %v598_v11 = vshll.u32 %v2997_v49, 16  ;;  %v764_v1 = vrot.slane %v763_v63, 4  ;;  %v595_v14 = vor.u32 %v3075_v54, %v3103_v30  ;;  %v1010_v7 = vsel %vm2694_vm5, %v2297_v8, %v1009_v56 }
  0x74   : > { %1472 = vrot.lane.b32.xlu1 %v3087_v9, %s2633_s9  ;;  %v759_v34 = vsel %vm2734_vm6, %v754_v3, %v758_v40  ;;  %v1013_v24 = vsel %vm2694_vm5, %v1011_v16, %v1012_v19  ;;  %v586_v25 = vrot.slane %v585_v20, 4  ;;  %vm1655_vm0 = vcmask 588800  }
  0x75   : > { %v3238_v43 = vcombine.low %v1010_v7, %v1013_v24  ;;  %v596_v32 = vrot.slane %v595_v14, 4  ;;  %v600_v54 = vrot.slane %v598_v11, 5 }
  0x76   : > { %v591_v5 = vsel %vm2734_vm6, %v586_v25, %v3103_v30 }
  0x77   : > { %1546 = vrot.lane.b32.xlu0 %v2993_v17, %s2634_s10  ;;  %v601_v29 = vsel %vm2734_vm6, %v596_v32, %v600_v54 }
  0x78   : > { %830 = vrot.lane.b32.xlu1 %v2991_v46, %s2630_s26  ;;  %v769_v46 = vsel %vm2734_vm6, %v764_v1, %v768_v57  ;;  %v2274_v37 = vcombine.low %v591_v5, %v601_v29  ;;  %v3410_v29 = vld [vmem:[%s2674_s20 + $0xc0] sm:$0xf] }
  0x79   : > { %v3241_v49 = vcombine.low %v759_v34, %v769_v46 }
  0x7b   : > { %1548 = vrot.lane.b32.xlu0 %v2305_v58, %s2634_s10 }
  0x7c   : > { %832 = vrot.lane.b32.xlu1 %v3087_v9, %s2630_s26 }
  0x7f   : > { %1074 = vrot.lane.b32.xlu0 %v2993_v17, %s2629_s23 }
  0x80   : > { %1076 = vrot.lane.b32.xlu1 %v2305_v58, %s2629_s23 }
  0x83   : > { %1144 = vrot.lane.b32.xlu0 %v2919_v2, %s2627_s21 }
  0x84   : > { %1146 = vrot.lane.b32.xlu1 %v2974_v39, %s2627_s21 }
  0x86   : > { %v1135_v21 = vpop.permute.xlu1 %1134 }
  0x87   : > { %1236 = vrot.lane.b32.xlu0 %v3087_v9, %s2631_s5  ;;  %v1133_v17 = vpop.permute.xlu0 %1132 }
  0x88   : > { %1238 = vrot.lane.b32.xlu1 %v2274_v37, %s2631_s5 }
  0x8b   : > { %1312 = vrot.lane.b32.xlu0 %v2305_v58, %s2628_s22 }
  0x8c   : > { %1314 = vrot.lane.b32.xlu1 %v3035_v6, %s2628_s22 }
  0x8d   : > { %v1301_v2 = vpop.permute.xlu0 %1300 }
  0x8f   : > { %1382 = vrot.lane.b32.xlu0 %v2974_v39, %s2632_s8 }
  0x90   : > { %1384 = vrot.lane.b32.xlu1 %v3017_v62, %s2632_s8  ;;  %v1063_v30 = vpop.permute.xlu1 %1062 }
  0x93   : > { %1474 = vrot.lane.b32.xlu0 %v2274_v37, %s2633_s9 }
  0x94   : > { %1476 = vrot.lane.b32.xlu1 %v3077_v59, %s2633_s9  ;;  %v1065_v9 = vpop.permute.xlu1 %1064 }
  0x95   : > { %v819_v33 = vpop.permute.xlu0 %818 }
  0x96   : > { %867 = vst.msk [vmem:[#allocation2] sm:$0xff] %vm866_vm8, %v819_v33 }
  0x97   : > { %1111 = vst.msk [vmem:[#allocation2] sm:$0xff] %vm1110_vm9, %v1063_v30  ;;  %1550 = vrot.lane.b32.xlu0 %v3035_v6, %s2634_s10 }
  0x98   : > { %834 = vrot.lane.b32.xlu1 %v2274_v37, %s2630_s26  ;;  %v1303_v39 = vpop.permute.xlu1 %1302  ;;  %1181 = vst.msk [vmem:[#allocation2] sm:$0xff] %vm1180_vm10, %v1133_v17  ;;  %v3413_v17 = vld [vmem:[%s2674_s20 + $0xc4] sm:$0xf] }
  0x99   : > { %v821_v31 = vpop.permute.xlu0 %820  ;;  %v1207_v30 = vshll.u32 %v3413_v17, 16 }
  0x9a   : > { %868 = vst.msk [vmem:[#allocation2 + $0x8] sm:$0xff] %vm866_vm8, %v821_v31 }
  0x9b   : > { %1112 = vst.msk [vmem:[#allocation2 + $0x8] sm:$0xff] %vm1110_vm9, %v1065_v9  ;;  %1552 = vrot.lane.b32.xlu0 %v3079_v60, %s2634_s10 }
  0x9c   : > { %836 = vrot.lane.b32.xlu1 %v3077_v59, %s2630_s26  ;;  %1182 = vst.msk [vmem:[#allocation2 + $0x8] sm:$0xff] %vm1180_vm10, %v1135_v21  ;;  %v1198_v21 = vshrl.u32 %v3410_v29, 16 }
  0x9d   : > { %v1225_v15 = vpop.permute.xlu0 %1224 }
  0x9e   : > { %v1227_v26 = vpop.permute.xlu1 %1226  ;;  %1273 = vst.msk [vmem:[#allocation2] sm:$0xff] %vm1272_vm11, %v1225_v15  ;;  %v1209_v15 = vrot.slane %v1207_v30, 5 }
  0x9f   : > { %1274 = vst.msk [vmem:[#allocation2 + $0x8] sm:$0xff] %vm1272_vm11, %v1227_v26  ;;  %1078 = vrot.lane.b32.xlu0 %v3035_v6, %s2629_s23 }
  0xa0   : > { %1349 = vst.msk [vmem:[#allocation2] sm:$0xff] %vm1348_vm12, %v1301_v2  ;;  %1080 = vrot.lane.b32.xlu1 %v3079_v60, %s2629_s23  ;;  %1350 = vst.msk [vmem:[#allocation2 + $0x8] sm:$0xff] %vm1348_vm12, %v1303_v39  ;;  %v1211_v2 = vshrl.u32 %v3413_v17, 16 }
  0xa1   : > { %v1371_v38 = vpop.permute.xlu0 %1370 }
  0xa2   : > { %1419 = vst.msk [vmem:[#allocation2] sm:$0xff] %vm1418_vm13, %v1371_v38  ;;  %v1373_v28 = vpop.permute.xlu1 %1372  ;;  %v1213_v26 = vrot.slane %v1211_v2, 4 }
  0xa3   : > { %1420 = vst.msk [vmem:[#allocation2 + $0x8] sm:$0xff] %vm1418_vm13, %v1373_v28  ;;  %1148 = vrot.lane.b32.xlu0 %v3017_v62, %s2627_s21 }
  0xa4   : > { %1150 = vrot.lane.b32.xlu1 %v3066_v50, %s2627_s21 }
  0xa5   : > { %v1463_v6 = vpop.permute.xlu0 %1462 }
  0xa6   : > { %1511 = vst.msk [vmem:[#allocation2] sm:$0xff] %vm1510_vm14, %v1463_v6  ;;  %v1465_v53 = vpop.permute.xlu1 %1464  ;;  %v266_v6 = vld [vmem:[%s2674_s20 + $0xc8] sm:$0x1] }
  0xa7   : > { %1512 = vst.msk [vmem:[#allocation2 + $0x8] sm:$0xff] %vm1510_vm14, %v1465_v53  ;;  %1240 = vrot.lane.b32.xlu0 %v3077_v59, %s2631_s5 }
  0xa8   : > { %1242 = vrot.lane.b32.xlu1 %v3119_v48, %s2631_s5 }
  0xa9   : > { %v1539_v27 = vpop.permute.xlu0 %1538 }
  0xaa   : > { %1587 = vst.msk [vmem:[#allocation2] sm:$0xff] %vm1586_vm15, %v1539_v27  ;;  %v823_v62 = vpop.permute.xlu1 %822 }
  0xab   : > { %869 = vst.msk [vmem:[#allocation2 + $0x10] sm:$0xff] %vm866_vm8, %v823_v62  ;;  %1316 = vrot.lane.b32.xlu0 %v3079_v60, %s2628_s22  ;;  %v1214_v62 = vor.u32 %v1213_v26, %v1209_v15 }
  0xac   : > { %1318 = vrot.lane.b32.xlu1 %v3109_v18, %s2628_s22 }
  0xad   : > { %v1541_v41 = vpop.permute.xlu0 %1540 }
  0xae   : > { %1588 = vst.msk [vmem:[#allocation2 + $0x8] sm:$0xff] %vm1586_vm15, %v1541_v41  ;;  %v825_v59 = vpop.permute.xlu1 %824  ;;  %v1217_v41 = vshll.u32 %v266_v6, 16 }
  0xaf   : > { %870 = vst.msk [vmem:[#allocation2 + $0x18] sm:$0xff] %vm866_vm8, %v825_v59  ;;  %1386 = vrot.lane.b32.xlu0 %v3066_v50, %s2632_s8 }
  0xb0   : > { %1388 = vrot.lane.b32.xlu1 %v3092_v22, %s2632_s8 }
  0xb1   : > { %v1067_v40 = vpop.permute.xlu0 %1066  ;;  %v1603_v36 = vld [vmem:[#allocation2] sm:$0xff] }
  0xb2   : > { %1113 = vst.msk [vmem:[#allocation2 + $0x10] sm:$0xff] %vm1110_vm9, %v1067_v40  ;;  %v1069_v60 = vpop.permute.xlu1 %1068  ;;  %2536 = vmatprep.mubr.msk.bf16.mxu0 %vm1655_vm0, %v1603_v36  ;;  %v3441_v40 = vld [vmem:[%s2674_s20 + $0xcc] sm:$0xf] }
  0xb3   : > { %1114 = vst.msk [vmem:[#allocation2 + $0x18] sm:$0xff] %vm1110_vm9, %v1069_v60  ;;  %1478 = vrot.lane.b32.xlu0 %v3119_v48, %s2633_s9  ;;  %v3445_v60 = vld [vmem:[%s2674_s20 + $0xd0] sm:$0xf]  ;;  %v2320_v30 = vrot.slane %v3441_v40, 9 }
  0xb4   : > { %1480 = vrot.lane.b32.xlu1 %v3149_v47, %s2633_s9 }
  0xb5   : > { %v1137_v50 = vpop.permute.xlu0 %1136  ;;  %v1604_v4 = vld [vmem:[#allocation2 + $0x8] sm:$0xff] }
  0xb6   : > { %1183 = vst.msk [vmem:[#allocation2 + $0x10] sm:$0xff] %vm1180_vm10, %v1137_v50  ;;  %v1139_v56 = vpop.permute.xlu1 %1138  ;;  %2537 = vmatmul.mubr.msk.bf16.vlgmr.msra.gmra.mrb[0].mxu0 %vm1655_vm0, %v1604_v4  ;;  %v1219_v4 = vrot.slane %v1217_v41, 5 }
  0xb7   : > { %1184 = vst.msk [vmem:[#allocation2 + $0x18] sm:$0xff] %vm1180_vm10, %v1139_v56  ;;  %1554 = vrot.lane.b32.xlu0 %v3109_v18, %s2634_s10  ;;  %v1436_v56 = vshrl.u32 %v3441_v40, 16 }
  0xb8   : > { %838 = vrot.lane.b32.xlu1 %v3119_v48, %s2630_s26 }
  0xb9   : > { %v1229_v58 = vpop.permute.xlu0 %1228 }
  0xba   : > { %1275 = vst.msk [vmem:[#allocation2 + $0x10] sm:$0xff] %vm1272_vm11, %v1229_v58  ;;  %v1231_v63 = vpop.permute.xlu1 %1230  ;;  %v1439_v58 = vshll.u32 %v3441_v40, 16 }
  0xbb   : > { %1276 = vst.msk [vmem:[#allocation2 + $0x18] sm:$0xff] %vm1272_vm11, %v1231_v63  ;;  %1556 = vrot.lane.b32.xlu0 %v3136_v10, %s2634_s10 }
  0xbc   : > { %840 = vrot.lane.b32.xlu1 %v3149_v47, %s2630_s26 }
  0xbd   : > { %v1305_v57 = vpop.permute.xlu0 %1304 }
  0xbe   : > { %1351 = vst.msk [vmem:[#allocation2 + $0x10] sm:$0xff] %vm1348_vm12, %v1305_v57  ;;  %v1307_v3 = vpop.permute.xlu1 %1306  ;;  %v1292_v57 = vrot.slane %v3413_v17, 5 }
  0xbf   : > { %1352 = vst.msk [vmem:[#allocation2 + $0x18] sm:$0xff] %vm1348_vm12, %v1307_v3  ;;  %1082 = vrot.lane.b32.xlu0 %v3109_v18, %s2629_s23  ;;  %v1449_v3 = vshrl.u32 %v3445_v60, 16 }
  0xc0   : > { %1084 = vrot.lane.b32.xlu1 %v3136_v10, %s2629_s23 }
  0xc1   : > { %v1375_v48 = vpop.permute.xlu0 %1374 }
  0xc2   : > { %1421 = vst.msk [vmem:[#allocation2 + $0x10] sm:$0xff] %vm1418_vm13, %v1375_v48  ;;  %v1377_v8 = vpop.permute.xlu1 %1376  ;;  %v1445_v48 = vshll.u32 %v3445_v60, 16 }
  0xc3   : > { %1422 = vst.msk [vmem:[#allocation2 + $0x18] sm:$0xff] %vm1418_vm13, %v1377_v8  ;;  %1152 = vrot.lane.b32.xlu0 %v3092_v22, %s2627_s21 }
  0xc4   : > { %1154 = vrot.lane.b32.xlu1 %v3121_v12, %s2627_s21 }
  0xc5   : > { %v1467_v16 = vpop.permute.xlu0 %1466 }
  0xc6   : > { %1513 = vst.msk [vmem:[#allocation2 + $0x10] sm:$0xff] %vm1510_vm14, %v1467_v16  ;;  %v1469_v19 = vpop.permute.xlu1 %1468  ;;  %v2314_v16 = vcombine.low %v3410_v29, %v3413_v17  ;;  %v1530_v17 = vrot.slane %v3445_v60, 5 }
  0xc7   : > { %1514 = vst.msk [vmem:[#allocation2 + $0x18] sm:$0xff] %vm1510_vm14, %v1469_v19  ;;  %1244 = vrot.lane.b32.xlu0 %v3149_v47, %s2631_s5 }
  0xc8   : > { %1246 = vrot.lane.b32.xlu1 %v3168_v23, %s2631_s5  ;;  %v1531_v52 = vsel %vm2694_vm5, %v2320_v30, %v1530_v17 }
  0xc9   : > { %v1543_v18 = vpop.permute.xlu0 %1542 }
  0xca   : > { %1589 = vst.msk [vmem:[#allocation2 + $0x10] sm:$0xff] %vm1586_vm15, %v1543_v18  ;;  %v827_v20 = vpop.permute.xlu1 %826 }
  0xcb   : > { %871 = vst.msk [vmem:[#allocation2 + $0x20] sm:$0xff] %vm866_vm8, %v827_v20  ;;  %1320 = vrot.lane.b32.xlu0 %v3136_v10, %s2628_s22  ;;  %v2316_v20 = vrot.slane %v3410_v29, 9 }
  0xcc   : > { %1322 = vrot.lane.b32.xlu1 %v3161_v0, %s2628_s22 }
  0xcd   : > { %v1545_v22 = vpop.permute.xlu0 %1544 }
  0xce   : > { %1590 = vst.msk [vmem:[#allocation2 + $0x18] sm:$0xff] %vm1586_vm15, %v1545_v22  ;;  %v829_v11 = vpop.permute.xlu1 %828  ;;  %v1438_v22 = vrot.slane %v1436_v56, 4 }
  0xcf   : > { %872 = vst.msk [vmem:[#allocation2 + $0x28] sm:$0xff] %vm866_vm8, %v829_v11  ;;  %1390 = vrot.lane.b32.xlu0 %v3121_v12, %s2632_s8  ;;  %v1441_v11 = vrot.slane %v1439_v58, 5 }
  0xd0   : > { %1392 = vrot.lane.b32.xlu1 %v3144_v42, %s2632_s8 }
  0xd1   : > { %v1071_v47 = vpop.permute.xlu0 %1070  ;;  %v1605_v1 = vld [vmem:[#allocation2 + $0x10] sm:$0xff] }
  0xd2   : > { %1115 = vst.msk [vmem:[#allocation2 + $0x20] sm:$0xff] %vm1110_vm9, %v1071_v47  ;;  %v1073_v10 = vpop.permute.xlu1 %1072  ;;  %2540 = vmatprep.mubr.msk.bf16.mxu0 %vm1655_vm0, %v1605_v1  ;;  %v1294_v1 = vrot.slane %v1292_v57, 4 }
  0xd3   : > { %1116 = vst.msk [vmem:[#allocation2 + $0x28] sm:$0xff] %vm1110_vm9, %v1073_v10  ;;  %1482 = vrot.lane.b32.xlu0 %v3168_v23, %s2633_s9  ;;  %v1295_v10 = vrot.slane %v266_v6, 5 }
  0xd4   : > { %1484 = vrot.lane.b32.xlu1 %v3194_v61, %s2633_s9 }
  0xd5   : > { %v1141_v14 = vpop.permute.xlu0 %1140  ;;  %v1606_v12 = vld [vmem:[#allocation2 + $0x18] sm:$0xff] }
  0xd6   : > { %1185 = vst.msk [vmem:[#allocation2 + $0x20] sm:$0xff] %vm1180_vm10, %v1141_v14  ;;  %v1143_v34 = vpop.permute.xlu1 %1142  ;;  %2541 = vmatmul.mubr.msk.bf16.gmra.mrb[4].mxu0 %vm1655_vm0, %v1606_v12  ;;  %v1451_v14 = vrot.slane %v1449_v3, 4 }
  0xd7   : > { %1186 = vst.msk [vmem:[#allocation2 + $0x28] sm:$0xff] %vm1180_vm10, %v1143_v34  ;;  %1558 = vrot.lane.b32.xlu0 %v3161_v0, %s2634_s10  ;;  %v269_v34 = vld [vmem:[%s2674_s20 + $0xd4] sm:$0x1] }
  0xd8   : > { %842 = vrot.lane.b32.xlu1 %v3168_v23, %s2630_s26 }
  0xd9   : > { %v1233_v7 = vpop.permute.xlu0 %1232 }
  0xda   : > { %1277 = vst.msk [vmem:[#allocation2 + $0x20] sm:$0xff] %vm1272_vm11, %v1233_v7  ;;  %v1235_v24 = vpop.permute.xlu1 %1234 }
  0xdb   : > { %1278 = vst.msk [vmem:[#allocation2 + $0x28] sm:$0xff] %vm1272_vm11, %v1235_v24  ;;  %1560 = vrot.lane.b32.xlu0 %v3188_v55, %s2634_s10  ;;  %v1442_v24 = vor.u32 %v1441_v11, %v1438_v22 }
  0xdc   : > { %844 = vrot.lane.b32.xlu1 %v3194_v61, %s2630_s26 }
  0xdd   : > { %v1309_v46 = vpop.permute.xlu0 %1308 }
  0xde   : > { %1353 = vst.msk [vmem:[#allocation2 + $0x20] sm:$0xff] %vm1348_vm12, %v1309_v46  ;;  %v1311_v25 = vpop.permute.xlu1 %1310 }
  0xdf   : > { %1354 = vst.msk [vmem:[#allocation2 + $0x28] sm:$0xff] %vm1348_vm12, %v1311_v25  ;;  %1086 = vrot.lane.b32.xlu0 %v3161_v0, %s2629_s23  ;;  %v1293_v25 = vsel %vm2694_vm5, %v2316_v20, %v1292_v57 }
  0xe0   : > { %1088 = vrot.lane.b32.xlu1 %v3188_v55, %s2629_s23 }
  0xe1   : > { %v1379_v23 = vpop.permute.xlu0 %1378 }
  0xe2   : > { %1423 = vst.msk [vmem:[#allocation2 + $0x20] sm:$0xff] %vm1418_vm13, %v1379_v23  ;;  %v1381_v32 = vpop.permute.xlu1 %1380  ;;  %v1296_v23 = vsel %vm2694_vm5, %v1294_v1, %v1295_v10 }
  0xe3   : > { %1424 = vst.msk [vmem:[#allocation2 + $0x28] sm:$0xff] %vm1418_vm13, %v1381_v32  ;;  %1156 = vrot.lane.b32.xlu0 %v3144_v42, %s2627_s21 }
  0xe4   : > { %1158 = vrot.lane.b32.xlu1 %v3171_v35, %s2627_s21 }
  0xe5   : > { %v1471_v54 = vpop.permute.xlu0 %1470 }
  0xe6   : > { %1515 = vst.msk [vmem:[#allocation2 + $0x20] sm:$0xff] %vm1510_vm14, %v1471_v54  ;;  %v1473_v0 = vpop.permute.xlu1 %1472  ;;  %v1455_v54 = vshll.u32 %v269_v34, 16 }
  0xe7   : > { %1516 = vst.msk [vmem:[#allocation2 + $0x28] sm:$0xff] %vm1510_vm14, %v1473_v0  ;;  %1248 = vrot.lane.b32.xlu0 %v3194_v61, %s2631_s5 }
  0xe8   : > { %1250 = vrot.lane.b32.xlu1 %v3215_v44, %s2631_s5 }
  0xe9   : > { %v1547_v5 = vpop.permute.xlu0 %1546 }
  0xea   : > { %1591 = vst.msk [vmem:[#allocation2 + $0x20] sm:$0xff] %vm1586_vm15, %v1547_v5  ;;  %v831_v42 = vpop.permute.xlu1 %830  ;;  %v1443_v5 = vrot.slane %v1442_v24, 4 }
  0xeb   : > { %873 = vst.msk [vmem:[#allocation2 + $0x30] sm:$0xff] %vm866_vm8, %v831_v42  ;;  %1324 = vrot.lane.b32.xlu0 %v3188_v55, %s2628_s22  ;;  %v1201_v55 = vshll.u32 %v3410_v29, 16 }
  0xec   : > { %1326 = vrot.lane.b32.xlu1 %v3217_v51, %s2628_s22 }
  0xed   : > { %v1549_v37 = vpop.permute.xlu0 %1548  ;;  %v1203_v31 = vrot.slane %v1201_v55, 5 }
  0xee   : > { %1592 = vst.msk [vmem:[#allocation2 + $0x28] sm:$0xff] %vm1586_vm15, %v1549_v37  ;;  %v833_v61 = vpop.permute.xlu1 %832  ;;  %v1457_v37 = vrot.slane %v1455_v54, 5 }
  0xef   : > { %874 = vst.msk [vmem:[#allocation2 + $0x38] sm:$0xff] %vm866_vm8, %v833_v61  ;;  %1394 = vrot.lane.b32.xlu0 %v3171_v35, %s2632_s8  ;;  %v1200_v35 = vrot.slane %v1198_v21, 4 }
  0xf0   : > { %1396 = vrot.lane.b32.xlu1 %v3198_v45, %s2632_s8 }
  0xf1   : > { %v1075_v9 = vpop.permute.xlu0 %1074  ;;  %v1607_v33 = vld [vmem:[#allocation2 + $0x20] sm:$0xff]  ;;  %v1204_v27 = vor.u32 %v1203_v31, %v1200_v35 }
  0xf2   : > { %1117 = vst.msk [vmem:[#allocation2 + $0x30] sm:$0xff] %vm1110_vm9, %v1075_v9  ;;  %v1077_v39 = vpop.permute.xlu1 %1076  ;;  %2544 = vmatprep.mubr.msk.bf16.mxu0 %vm1655_vm0, %v1607_v33  ;;  %v1532_v9 = vrot.slane %v1530_v17, 4  ;;  %v1533_v33 = vrot.slane %v269_v34, 5 }
  0xf3   : > { %1118 = vst.msk [vmem:[#allocation2 + $0x38] sm:$0xff] %vm1110_vm9, %v1077_v39  ;;  %1486 = vrot.lane.b32.xlu0 %v3215_v44, %s2633_s9  ;;  %v1205_v50 = vrot.slane %v1204_v27, 4 }
  0xf4   : > { %1488 = vrot.lane.b32.xlu1 %v3241_v49, %s2633_s9 }
  0xf5   : > { %v1145_v38 = vpop.permute.xlu0 %1144  ;;  %v1608_v28 = vld [vmem:[#allocation2 + $0x28] sm:$0xff]  ;;  %v1210_v19 = vsel %vm2734_vm6, %v1205_v50, %v1209_v15  ;;  %v1534_v15 = vsel %vm2694_vm5, %v1532_v9, %v1533_v33 }
  0xf6   : > { %1187 = vst.msk [vmem:[#allocation2 + $0x30] sm:$0xff] %vm1180_vm10, %v1145_v38  ;;  %v1147_v53 = vpop.permute.xlu1 %1146  ;;  %2545 = vmatmul.mubr.msk.bf16.gmra.mrb[8].mxu0 %vm1655_vm0, %v1608_v28  ;;  %v2321_v38 = vcombine.low %v1531_v52, %v1534_v15 }
  0xf7   : > { %1188 = vst.msk [vmem:[#allocation2 + $0x38] sm:$0xff] %vm1180_vm10, %v1147_v53  ;;  %1562 = vrot.lane.b32.xlu0 %v3217_v51, %s2634_s10 }
  0xf8   : > { %846 = vrot.lane.b32.xlu1 %v3215_v44, %s2630_s26  ;;  %v1215_v44 = vrot.slane %v1214_v62, 4 }
  0xf9   : > { %v1237_v59 = vpop.permute.xlu0 %1236 }
  0xfa   : > { %1279 = vst.msk [vmem:[#allocation2 + $0x30] sm:$0xff] %vm1272_vm11, %v1237_v59  ;;  %v1239_v36 = vpop.permute.xlu1 %1238  ;;  %v1220_v18 = vsel %vm2734_vm6, %v1215_v44, %v1219_v4 }
  0xfb   : > { %1280 = vst.msk [vmem:[#allocation2 + $0x38] sm:$0xff] %vm1272_vm11, %v1239_v36  ;;  %1564 = vrot.lane.b32.xlu0 %v3238_v43, %s2634_s10  ;;  %v2315_v7 = vcombine.low %v1210_v19, %v1220_v18 }
  0xfc   : > { %848 = vrot.lane.b32.xlu1 %v3241_v49, %s2630_s26 }
  0xfd   : > { %v1313_v63 = vpop.permute.xlu0 %1312 }
  0xfe   : > { %1355 = vst.msk [vmem:[#allocation2 + $0x30] sm:$0xff] %vm1348_vm12, %v1313_v63  ;;  %v1315_v8 = vpop.permute.xlu1 %1314 }
  0xff   : > { %1356 = vst.msk [vmem:[#allocation2 + $0x38] sm:$0xff] %vm1348_vm12, %v1315_v8  ;;  %1090 = vrot.lane.b32.xlu0 %v3217_v51, %s2629_s23  ;;  %v1447_v51 = vrot.slane %v1445_v48, 5 }
 0x100   : > { %1092 = vrot.lane.b32.xlu1 %v3238_v43, %s2629_s23 }
 0x101   : > { %v1383_v47 = vpop.permute.xlu0 %1382  ;;  %v1452_v32 = vor.u32 %v1451_v14, %v1447_v51  ;;  %v1448_v21 = vsel %vm2734_vm6, %v1443_v5, %v1447_v51 }
 0x102   : > { %1425 = vst.msk [vmem:[#allocation2 + $0x30] sm:$0xff] %vm1418_vm13, %v1383_v47  ;;  %v1385_v12 = vpop.permute.xlu1 %1384 }
 0x103   : > { %1426 = vst.msk [vmem:[#allocation2 + $0x38] sm:$0xff] %vm1418_vm13, %v1385_v12  ;;  %1160 = vrot.lane.b32.xlu0 %v3198_v45, %s2627_s21  ;;  %v2317_v45 = vcombine.low %v1293_v25, %v1296_v23  ;;  %v1453_v29 = vrot.slane %v1452_v32, 4 }
 0x104   : > { %1162 = vrot.lane.b32.xlu1 %v2314_v16, %s2627_s21  ;;  %s211_s21 = scalar_lea.vmem %s3618_s3, %s3625_s16 }
 0x105   : > { %v1475_v46 = vpop.permute.xlu0 %1474  ;;  %v1458_v2 = vsel %vm2734_vm6, %v1453_v29, %v1457_v37 }
 0x106   : > { %1517 = vst.msk [vmem:[#allocation2 + $0x30] sm:$0xff] %vm1510_vm14, %v1475_v46  ;;  %v1477_v0 = vpop.permute.xlu1 %1476 }
 0x107   : > { %1518 = vst.msk [vmem:[#allocation2 + $0x38] sm:$0xff] %vm1510_vm14, %v1477_v0  ;;  %1252 = vrot.lane.b32.xlu0 %v3241_v49, %s2631_s5  ;;  %v2318_v49 = vcombine.low %v3441_v40, %v3445_v60 }
 0x108   : > { %1254 = vrot.lane.b32.xlu1 %v2315_v7, %s2631_s5 }
 0x109   : > { %v1551_v42 = vpop.permute.xlu0 %1550 }
 0x10a   : > { %1593 = vst.msk [vmem:[#allocation2 + $0x30] sm:$0xff] %vm1586_vm15, %v1551_v42  ;;  %v835_v61 = vpop.permute.xlu1 %834 }
 0x10b   : > { %875 = vst.msk [vmem:[#allocation2 + $0x40] sm:$0xff] %vm866_vm8, %v835_v61  ;;  %1328 = vrot.lane.b32.xlu0 %v3238_v43, %s2628_s22  ;;  %v2319_v43 = vcombine.low %v1448_v21, %v1458_v2 }
 0x10c   : > { %1330 = vrot.lane.b32.xlu1 %v2317_v45, %s2628_s22 }
 0x10d   : > { %v1553_v55 = vpop.permute.xlu0 %1552 }
 0x10e   : > { %1594 = vst.msk [vmem:[#allocation2 + $0x38] sm:$0xff] %vm1586_vm15, %v1553_v55  ;;  %v837_v39 = vpop.permute.xlu1 %836 }
 0x10f   : > { %876 = vst.msk [vmem:[#allocation2 + $0x48] sm:$0xff] %vm866_vm8, %v837_v39  ;;  %1398 = vrot.lane.b32.xlu0 %v2314_v16, %s2632_s8 }
 0x110   : > { %1400 = vrot.lane.b32.xlu1 %v2318_v49, %s2632_s8 }
 0x111   : > { %v1079_v35 = vpop.permute.xlu0 %1078  ;;  %v1609_v31 = vld [vmem:[#allocation2 + $0x30] sm:$0xff] }
 0x112   : > { %1119 = vst.msk [vmem:[#allocation2 + $0x40] sm:$0xff] %vm1110_vm9, %v1079_v35  ;;  %v1081_v26 = vpop.permute.xlu1 %1080  ;;  %2548 = vmatprep.mubr.msk.bf16.mxu0 %vm1655_vm0, %v1609_v31 }
 0x113   : > { %1120 = vst.msk [vmem:[#allocation2 + $0x48] sm:$0xff] %vm1110_vm9, %v1081_v26  ;;  %1490 = vrot.lane.b32.xlu0 %v2315_v7, %s2633_s9 }
 0x114   : > { %1492 = vrot.lane.b32.xlu1 %v2319_v43, %s2633_s9 }
 0x115   : > { %v1149_v28 = vpop.permute.xlu0 %1148  ;;  %v1610_v6 = vld [vmem:[#allocation2 + $0x38] sm:$0xff] }
 0x116   : > { %1189 = vst.msk [vmem:[#allocation2 + $0x40] sm:$0xff] %vm1180_vm10, %v1149_v28  ;;  %v1151_v53 = vpop.permute.xlu1 %1150  ;;  %2549 = vmatmul.mubr.msk.bf16.gmra.mrb[12].mxu0 %vm1655_vm0, %v1610_v6 }
 0x117   : > { %1190 = vst.msk [vmem:[#allocation2 + $0x48] sm:$0xff] %vm1180_vm10, %v1151_v53  ;;  %1566 = vrot.lane.b32.xlu0 %v2317_v45, %s2634_s10 }
 0x118   : > { %1568 = vrot.lane.b32.xlu1 %v2321_v38, %s2634_s10 }
 0x119   : > { %v1241_v13 = vpop.permute.xlu0 %1240 }
 0x11a   : > { %1281 = vst.msk [vmem:[#allocation2 + $0x40] sm:$0xff] %vm1272_vm11, %v1241_v13  ;;  %v1243_v27 = vpop.permute.xlu1 %1242 }
 0x11b   : > { %1282 = vst.msk [vmem:[#allocation2 + $0x48] sm:$0xff] %vm1272_vm11, %v1243_v27 }
 0x11d   : > { %v1317_v62 = vpop.permute.xlu0 %1316 }
 0x11e   : > { %1357 = vst.msk [vmem:[#allocation2 + $0x40] sm:$0xff] %vm1348_vm12, %v1317_v62  ;;  %v1319_v41 = vpop.permute.xlu1 %1318 }
 0x11f   : > { %1358 = vst.msk [vmem:[#allocation2 + $0x48] sm:$0xff] %vm1348_vm12, %v1319_v41 }
 0x121   : > { %v1387_v59 = vpop.permute.xlu0 %1386 }
 0x122   : > { %1427 = vst.msk [vmem:[#allocation2 + $0x40] sm:$0xff] %vm1418_vm13, %v1387_v59  ;;  %v1389_v40 = vpop.permute.xlu1 %1388 }
 0x123   : > { %1428 = vst.msk [vmem:[#allocation2 + $0x48] sm:$0xff] %vm1418_vm13, %v1389_v40 }
 0x125   : > { %v1479_v36 = vpop.permute.xlu0 %1478 }
 0x126   : > { %1519 = vst.msk [vmem:[#allocation2 + $0x40] sm:$0xff] %vm1510_vm14, %v1479_v36  ;;  %v1481_v60 = vpop.permute.xlu1 %1480 }
 0x127   : > { %1520 = vst.msk [vmem:[#allocation2 + $0x48] sm:$0xff] %vm1510_vm14, %v1481_v60 }
 0x129   : > { %v1555_v50 = vpop.permute.xlu0 %1554 }
 0x12a   : > { %1595 = vst.msk [vmem:[#allocation2 + $0x40] sm:$0xff] %vm1586_vm15, %v1555_v50  ;;  %v839_v44 = vpop.permute.xlu1 %838 }
 0x12b   : > { %877 = vst.msk [vmem:[#allocation2 + $0x50] sm:$0xff] %vm866_vm8, %v839_v44 }
 0x12d   : > { %v1557_v4 = vpop.permute.xlu0 %1556 }
 0x12e   : > { %1596 = vst.msk [vmem:[#allocation2 + $0x48] sm:$0xff] %vm1586_vm15, %v1557_v4  ;;  %v841_v56 = vpop.permute.xlu1 %840 }
 0x12f   : > { %878 = vst.msk [vmem:[#allocation2 + $0x58] sm:$0xff] %vm866_vm8, %v841_v56 }
 0x131   : > { %v1083_v58 = vpop.permute.xlu0 %1082  ;;  %v1611_v63 = vld [vmem:[#allocation2 + $0x40] sm:$0xff] }
 0x132   : > { %1121 = vst.msk [vmem:[#allocation2 + $0x50] sm:$0xff] %vm1110_vm9, %v1083_v58  ;;  %v1085_v57 = vpop.permute.xlu1 %1084  ;;  %2552 = vmatprep.mubr.msk.bf16.mxu1 %vm1655_vm0, %v1611_v63 }
 0x133   : > { %1122 = vst.msk [vmem:[#allocation2 + $0x58] sm:$0xff] %vm1110_vm9, %v1085_v57 }
 0x135   : > { %v1153_v3 = vpop.permute.xlu0 %1152  ;;  %v1612_v48 = vld [vmem:[#allocation2 + $0x48] sm:$0xff] }
 0x136   : > { %1191 = vst.msk [vmem:[#allocation2 + $0x50] sm:$0xff] %vm1180_vm10, %v1153_v3  ;;  %v1155_v8 = vpop.permute.xlu1 %1154  ;;  %2553 = vmatmul.mubr.msk.bf16.vlgmr.msra.gmra.mrb[0].mxu1 %vm1655_vm0, %v1612_v48 }
 0x137   : > { %1192 = vst.msk [vmem:[#allocation2 + $0x58] sm:$0xff] %vm1180_vm10, %v1155_v8 }
 0x139   : > { %v1245_v16 = vpop.permute.xlu0 %1244 }
 0x13a   : > { %1283 = vst.msk [vmem:[#allocation2 + $0x50] sm:$0xff] %vm1272_vm11, %v1245_v16  ;;  %v1247_v19 = vpop.permute.xlu1 %1246 }
 0x13b   : > { %1284 = vst.msk [vmem:[#allocation2 + $0x58] sm:$0xff] %vm1272_vm11, %v1247_v19 }
 0x13d   : > { %v1321_v18 = vpop.permute.xlu0 %1320 }
 0x13e   : > { %1359 = vst.msk [vmem:[#allocation2 + $0x50] sm:$0xff] %vm1348_vm12, %v1321_v18  ;;  %v1323_v20 = vpop.permute.xlu1 %1322 }
 0x13f   : > { %1360 = vst.msk [vmem:[#allocation2 + $0x58] sm:$0xff] %vm1348_vm12, %v1323_v20 }
 0x141   : > { %v1391_v22 = vpop.permute.xlu0 %1390 }
 0x142   : > { %1429 = vst.msk [vmem:[#allocation2 + $0x50] sm:$0xff] %vm1418_vm13, %v1391_v22  ;;  %v1393_v11 = vpop.permute.xlu1 %1392 }
 0x143   : > { %1430 = vst.msk [vmem:[#allocation2 + $0x58] sm:$0xff] %vm1418_vm13, %v1393_v11 }
 0x145   : > { %v1483_v47 = vpop.permute.xlu0 %1482 }
 0x146   : > { %1521 = vst.msk [vmem:[#allocation2 + $0x50] sm:$0xff] %vm1510_vm14, %v1483_v47  ;;  %v1485_v1 = vpop.permute.xlu1 %1484 }
 0x147   : > { %1522 = vst.msk [vmem:[#allocation2 + $0x58] sm:$0xff] %vm1510_vm14, %v1485_v1 }
 0x149   : > { %v1559_v10 = vpop.permute.xlu0 %1558 }
 0x14a   : > { %1597 = vst.msk [vmem:[#allocation2 + $0x50] sm:$0xff] %vm1586_vm15, %v1559_v10  ;;  %v843_v51 = vpop.permute.xlu1 %842 }
 0x14b   : > { %879 = vst.msk [vmem:[#allocation2 + $0x60] sm:$0xff] %vm866_vm8, %v843_v51 }
 0x14d   : > { %v1561_v14 = vpop.permute.xlu0 %1560 }
 0x14e   : > { %1598 = vst.msk [vmem:[#allocation2 + $0x58] sm:$0xff] %vm1586_vm15, %v1561_v14  ;;  %v845_v12 = vpop.permute.xlu1 %844 }
 0x14f   : > { %880 = vst.msk [vmem:[#allocation2 + $0x68] sm:$0xff] %vm866_vm8, %v845_v12 }
 0x151   : > { %v1087_v34 = vpop.permute.xlu0 %1086  ;;  %v1613_v7 = vld [vmem:[#allocation2 + $0x50] sm:$0xff] }
 0x152   : > { %1123 = vst.msk [vmem:[#allocation2 + $0x60] sm:$0xff] %vm1110_vm9, %v1087_v34  ;;  %v1089_v24 = vpop.permute.xlu1 %1088  ;;  %2556 = vmatprep.mubr.msk.bf16.mxu1 %vm1655_vm0, %v1613_v7 }
 0x153   : > { %1124 = vst.msk [vmem:[#allocation2 + $0x68] sm:$0xff] %vm1110_vm9, %v1089_v24 }
 0x155   : > { %v1157_v46 = vpop.permute.xlu0 %1156  ;;  %v1614_v25 = vld [vmem:[#allocation2 + $0x58] sm:$0xff] }
 0x156   : > { %1193 = vst.msk [vmem:[#allocation2 + $0x60] sm:$0xff] %vm1180_vm10, %v1157_v46  ;;  %v1159_v23 = vpop.permute.xlu1 %1158  ;;  %2557 = vmatmul.mubr.msk.bf16.gmra.mrb[4].mxu1 %vm1655_vm0, %v1614_v25 }
 0x157   : > { %1194 = vst.msk [vmem:[#allocation2 + $0x68] sm:$0xff] %vm1180_vm10, %v1159_v23 }
 0x159   : > { %v1249_v32 = vpop.permute.xlu0 %1248 }
 0x15a   : > { %1285 = vst.msk [vmem:[#allocation2 + $0x60] sm:$0xff] %vm1272_vm11, %v1249_v32  ;;  %v1251_v54 = vpop.permute.xlu1 %1250 }
 0x15b   : > { %1286 = vst.msk [vmem:[#allocation2 + $0x68] sm:$0xff] %vm1272_vm11, %v1251_v54 }
 0x15d   : > { %v1325_v0 = vpop.permute.xlu0 %1324 }
 0x15e   : > { %1361 = vst.msk [vmem:[#allocation2 + $0x60] sm:$0xff] %vm1348_vm12, %v1325_v0  ;;  %v1327_v45 = vpop.permute.xlu1 %1326 }
 0x15f   : > { %1362 = vst.msk [vmem:[#allocation2 + $0x68] sm:$0xff] %vm1348_vm12, %v1327_v45 }
 0x161   : > { %v1395_v5 = vpop.permute.xlu0 %1394 }
 0x162   : > { %1431 = vst.msk [vmem:[#allocation2 + $0x60] sm:$0xff] %vm1418_vm13, %v1395_v5  ;;  %v1397_v42 = vpop.permute.xlu1 %1396 }
 0x163   : > { %1432 = vst.msk [vmem:[#allocation2 + $0x68] sm:$0xff] %vm1418_vm13, %v1397_v42 }
 0x165   : > { %v1487_v29 = vpop.permute.xlu0 %1486 }
 0x166   : > { %1523 = vst.msk [vmem:[#allocation2 + $0x60] sm:$0xff] %vm1510_vm14, %v1487_v29  ;;  %v1489_v37 = vpop.permute.xlu1 %1488 }
 0x167   : > { %1524 = vst.msk [vmem:[#allocation2 + $0x68] sm:$0xff] %vm1510_vm14, %v1489_v37 }
 0x169   : > { %v1563_v17 = vpop.permute.xlu0 %1562 }
 0x16a   : > { %1599 = vst.msk [vmem:[#allocation2 + $0x60] sm:$0xff] %vm1586_vm15, %v1563_v17  ;;  %v847_v61 = vpop.permute.xlu1 %846 }
 0x16b   : > { %881 = vst.msk [vmem:[#allocation2 + $0x70] sm:$0xff] %vm866_vm8, %v847_v61 }
 0x16d   : > { %v1565_v49 = vpop.permute.xlu0 %1564 }
 0x16e   : > { %1600 = vst.msk [vmem:[#allocation2 + $0x68] sm:$0xff] %vm1586_vm15, %v1565_v49  ;;  %v849_v21 = vpop.permute.xlu1 %848 }
 0x16f   : > { %882 = vst.msk [vmem:[#allocation2 + $0x78] sm:$0xff] %vm866_vm8, %v849_v21 }
 0x171   : > { %v1091_v55 = vpop.permute.xlu0 %1090  ;;  %v1615_v2 = vld [vmem:[#allocation2 + $0x60] sm:$0xff] }
 0x172   : > { %1125 = vst.msk [vmem:[#allocation2 + $0x70] sm:$0xff] %vm1110_vm9, %v1091_v55  ;;  %v1093_v30 = vpop.permute.xlu1 %1092  ;;  %2560 = vmatprep.mubr.msk.bf16.mxu1 %vm1655_vm0, %v1615_v2 }
 0x173   : > { %1126 = vst.msk [vmem:[#allocation2 + $0x78] sm:$0xff] %vm1110_vm9, %v1093_v30 }
 0x175   : > { %v1161_v9 = vpop.permute.xlu0 %1160  ;;  %v1616_v33 = vld [vmem:[#allocation2 + $0x68] sm:$0xff] }
 0x176   : > { %1195 = vst.msk [vmem:[#allocation2 + $0x70] sm:$0xff] %vm1180_vm10, %v1161_v9  ;;  %v1163_v39 = vpop.permute.xlu1 %1162  ;;  %2561 = vmatmul.mubr.msk.bf16.gmra.mrb[8].mxu1 %vm1655_vm0, %v1616_v33 }
 0x177   : > { %1196 = vst.msk [vmem:[#allocation2 + $0x78] sm:$0xff] %vm1180_vm10, %v1163_v39 }
 0x179   : > { %v1253_v43 = vpop.permute.xlu0 %1252 }
 0x17a   : > { %1287 = vst.msk [vmem:[#allocation2 + $0x70] sm:$0xff] %vm1272_vm11, %v1253_v43  ;;  %v1255_v35 = vpop.permute.xlu1 %1254 }
 0x17b   : > { %1288 = vst.msk [vmem:[#allocation2 + $0x78] sm:$0xff] %vm1272_vm11, %v1255_v35 }
 0x17d   : > { %v1329_v31 = vpop.permute.xlu0 %1328 }
 0x17e   : > { %1363 = vst.msk [vmem:[#allocation2 + $0x70] sm:$0xff] %vm1348_vm12, %v1329_v31  ;;  %v1331_v52 = vpop.permute.xlu1 %1330 }
 0x17f   : > { %1364 = vst.msk [vmem:[#allocation2 + $0x78] sm:$0xff] %vm1348_vm12, %v1331_v52 }
 0x181   : > { %v1399_v15 = vpop.permute.xlu0 %1398 }
 0x182   : > { %1433 = vst.msk [vmem:[#allocation2 + $0x70] sm:$0xff] %vm1418_vm13, %v1399_v15  ;;  %v1401_v26 = vpop.permute.xlu1 %1400 }
 0x183   : > { %1434 = vst.msk [vmem:[#allocation2 + $0x78] sm:$0xff] %vm1418_vm13, %v1401_v26 }
 0x185   : > { %v1491_v38 = vpop.permute.xlu0 %1490 }
 0x186   : > { %1525 = vst.msk [vmem:[#allocation2 + $0x70] sm:$0xff] %vm1510_vm14, %v1491_v38  ;;  %v1493_v28 = vpop.permute.xlu1 %1492 }
 0x187   : > { %1526 = vst.msk [vmem:[#allocation2 + $0x78] sm:$0xff] %vm1510_vm14, %v1493_v28 }
 0x189   : > { %v1567_v6 = vpop.permute.xlu0 %1566  ;;  %v2538_v53 = vpop.f32.mrb[0].mxu0 }
 0x18a   : > { %1601 = vst.msk [vmem:[#allocation2 + $0x70] sm:$0xff] %vm1586_vm15, %v1567_v6  ;;  %v1569_v13 = vpop.permute.xlu1 %1568  ;;  %v1742_v27 = vpop.f32.mrb[1].mxu0  ;;  %v2069_v44 = vmul.f32 %v2538_v53, %v2538_v53 }
 0x18b   : > { %1602 = vst.msk [vmem:[#allocation2 + $0x78] sm:$0xff] %vm1586_vm15, %v1569_v13  ;;  %v2539_v62 = vpop.f32.mrb[2].mxu0  ;;  %v2067_v40 = vmul.f32 %v1742_v27, %v1742_v27 }
 0x18c   : > { %v2418_v41 = vpack.c.bf16 %v2539_v62, %v2538_v53  ;;  %v1745_v59 = vpop.f32.mrb[3].mxu0  ;;  %v2070_v58 = vmul.f32 %v2539_v62, %v2539_v62 }
 0x18d   : > { %v2413_v36 = vpack.c.bf16 %v1745_v59, %v1742_v27  ;;  %v2029_v60 = vadd.f32 %v1745_v59, %v1742_v27  ;;  %v2068_v50 = vmul.f32 %v1745_v59, %v1745_v59 }
 0x18e   : > { %2490 = vst [vmem:[%s3584_s18 + $0x8] sm:$0xff] %v2418_v41  }
 0x18f   : > { %2414 = vst [vmem:[%s3584_s18] sm:$0xff] %v2413_v36   ;;  %v2030_v4 = vadd.f32 %v2538_v53, %v2029_v60  ;;  %v2099_v56 = vadd.f32 %v2068_v50, %v2067_v40 }
 0x191   : > { %v2100_v63 = vadd.f32 %v2099_v56, %v2069_v44  ;;  %v1617_v57 = vld [vmem:[#allocation2 + $0x70] sm:$0xff]  ;;  %v2031_v3 = vadd.f32 %v2539_v62, %v2030_v4 }
 0x192   : > { %2564 = vmatprep.mubr.msk.bf16.mxu1 %vm1655_vm0, %v1617_v57  ;;  %v1618_v48 = vld [vmem:[#allocation2 + $0x78] sm:$0xff] }
 0x193   : > { %2565 = vmatmul.mubr.msk.bf16.gmra.mrb[12].mxu1 %vm1655_vm0, %v1618_v48  ;;  %v2101_v8 = vadd.f32 %v2100_v63, %v2070_v58 }
 0x1a9   : > { %v2542_v16 = vpop.f32.mrb[4].mxu0 }
 0x1aa   : > { %v1758_v19 = vpop.f32.mrb[5].mxu0  ;;  %v2073_v12 = vmul.f32 %v2542_v16, %v2542_v16 }
 0x1ab   : > { %v2032_v18 = vadd.f32 %v2031_v3, %v1758_v19  ;;  %v2071_v20 = vmul.f32 %v1758_v19, %v1758_v19  ;;  %v2543_v22 = vpop.f32.mrb[6].mxu0 }
 0x1ac   : > { %v2428_v11 = vpack.c.bf16 %v2543_v22, %v2542_v16  ;;  %v1761_v47 = vpop.f32.mrb[7].mxu0  ;;  %v2074_v24 = vmul.f32 %v2543_v22, %v2543_v22 }
 0x1ad   : > { %v2102_v1 = vadd.f32 %v2101_v8, %v2071_v20  ;;  %v2423_v10 = vpack.c.bf16 %v1761_v47, %v1758_v19  ;;  %v2033_v51 = vadd.f32 %v2032_v18, %v1761_v47  ;;  %v2072_v14 = vmul.f32 %v1761_v47, %v1761_v47 }
 0x1ae   : > { %2492 = vst [vmem:[%s3584_s18 + $0x18] sm:$0xff] %v2428_v11  }
 0x1af   : > { %2491 = vst [vmem:[%s3584_s18 + $0x10] sm:$0xff] %v2423_v10   ;;  %v2034_v34 = vadd.f32 %v2542_v16, %v2033_v51  ;;  %v2103_v7 = vadd.f32 %v2102_v1, %v2072_v14 }
 0x1b1   : > { %v2104_v46 = vadd.f32 %v2103_v7, %v2073_v12  ;;  %v2035_v25 = vadd.f32 %v2543_v22, %v2034_v34 }
 0x1b3   : > { %v2105_v23 = vadd.f32 %v2104_v46, %v2074_v24 }
 0x1c9   : > { %v2546_v32 = vpop.f32.mrb[8].mxu0 }
 0x1ca   : > { %v1774_v54 = vpop.f32.mrb[9].mxu0  ;;  %v2077_v21 = vmul.f32 %v2546_v32, %v2546_v32 }
 0x1cb   : > { %v2036_v0 = vadd.f32 %v2035_v25, %v1774_v54  ;;  %v2075_v45 = vmul.f32 %v1774_v54, %v1774_v54  ;;  %v2547_v5 = vpop.f32.mrb[10].mxu0 }
 0x1cc   : > { %v2438_v42 = vpack.c.bf16 %v2547_v5, %v2546_v32  ;;  %v1777_v29 = vpop.f32.mrb[11].mxu0  ;;  %v2078_v30 = vmul.f32 %v2547_v5, %v2547_v5 }
 0x1cd   : > { %v2106_v37 = vadd.f32 %v2105_v23, %v2075_v45  ;;  %v2433_v17 = vpack.c.bf16 %v1777_v29, %v1774_v54  ;;  %v2037_v61 = vadd.f32 %v2036_v0, %v1777_v29  ;;  %v2076_v49 = vmul.f32 %v1777_v29, %v1777_v29 }
 0x1ce   : > { %2494 = vst [vmem:[%s3584_s18 + $0x28] sm:$0xff] %v2438_v42  }
 0x1cf   : > { %2493 = vst [vmem:[%s3584_s18 + $0x20] sm:$0xff] %v2433_v17   ;;  %v2038_v55 = vadd.f32 %v2546_v32, %v2037_v61  ;;  %v2107_v2 = vadd.f32 %v2106_v37, %v2076_v49 }
 0x1d1   : > { %v2108_v9 = vadd.f32 %v2107_v2, %v2077_v21  ;;  %v2039_v33 = vadd.f32 %v2547_v5, %v2038_v55 }
 0x1d3   : > { %v2109_v39 = vadd.f32 %v2108_v9, %v2078_v30 }
 0x1e9   : > { %v2550_v43 = vpop.f32.mrb[12].mxu0 }
 0x1ea   : > { %v1790_v35 = vpop.f32.mrb[13].mxu0  ;;  %v2081_v27 = vmul.f32 %v2550_v43, %v2550_v43 }
 0x1eb   : > { %v2040_v31 = vadd.f32 %v2039_v33, %v1790_v35  ;;  %v2079_v52 = vmul.f32 %v1790_v35, %v1790_v35  ;;  %v2551_v15 = vpop.f32.mrb[14].mxu0 }
 0x1ec   : > { %v2448_v26 = vpack.c.bf16 %v2551_v15, %v2550_v43  ;;  %v1793_v38 = vpop.f32.mrb[15].mxu0  ;;  %v2082_v59 = vmul.f32 %v2551_v15, %v2551_v15 }
 0x1ed   : > { %v2110_v28 = vadd.f32 %v2109_v39, %v2079_v52  ;;  %v2443_v6 = vpack.c.bf16 %v1793_v38, %v1790_v35  ;;  %v2041_v53 = vadd.f32 %v2040_v31, %v1793_v38  ;;  %v2080_v13 = vmul.f32 %v1793_v38, %v1793_v38 }
 0x1ee   : > { %2496 = vst [vmem:[%s3584_s18 + $0x38] sm:$0xff] %v2448_v26  }
 0x1ef   : > { %2495 = vst [vmem:[%s3584_s18 + $0x30] sm:$0xff] %v2443_v6   ;;  %v2042_v62 = vadd.f32 %v2550_v43, %v2041_v53  ;;  %v2111_v41 = vadd.f32 %v2110_v28, %v2080_v13 }
 0x1f1   : > { %v2112_v40 = vadd.f32 %v2111_v41, %v2081_v27  ;;  %v2043_v36 = vadd.f32 %v2551_v15, %v2042_v62 }
 0x1f3   : > { %v2113_v60 = vadd.f32 %v2112_v40, %v2082_v59 }
 0x209   : > { %v2554_v50 = vpop.f32.mrb[0].mxu1 }
 0x20a   : > { %v1806_v44 = vpop.f32.mrb[1].mxu1  ;;  %v2085_v19 = vmul.f32 %v2554_v50, %v2554_v50 }
 0x20b   : > { %v2044_v4 = vadd.f32 %v2043_v36, %v1806_v44  ;;  %v2083_v56 = vmul.f32 %v1806_v44, %v1806_v44  ;;  %v2555_v58 = vpop.f32.mrb[2].mxu1 }
 0x20c   : > { %v2458_v63 = vpack.c.bf16 %v2555_v58, %v2554_v50  ;;  %v1809_v57 = vpop.f32.mrb[3].mxu1  ;;  %v2086_v22 = vmul.f32 %v2555_v58, %v2555_v58 }
 0x20d   : > { %v2114_v3 = vadd.f32 %v2113_v60, %v2083_v56  ;;  %v2453_v48 = vpack.c.bf16 %v1809_v57, %v1806_v44  ;;  %v2045_v8 = vadd.f32 %v2044_v4, %v1809_v57  ;;  %v2084_v16 = vmul.f32 %v1809_v57, %v1809_v57 }
 0x20e   : > { %2498 = vst [vmem:[%s3584_s18 + $0x48] sm:$0xff] %v2458_v63  }
 0x20f   : > { %2497 = vst [vmem:[%s3584_s18 + $0x40] sm:$0xff] %v2453_v48   ;;  %v2046_v18 = vadd.f32 %v2554_v50, %v2045_v8  ;;  %v2115_v20 = vadd.f32 %v2114_v3, %v2084_v16 }
 0x211   : > { %v2116_v11 = vadd.f32 %v2115_v20, %v2085_v19  ;;  %v2047_v47 = vadd.f32 %v2555_v58, %v2046_v18 }
 0x213   : > { %v2117_v1 = vadd.f32 %v2116_v11, %v2086_v22 }
 0x229   : > { %v2558_v10 = vpop.f32.mrb[4].mxu1 }
 0x22a   : > { %v1822_v51 = vpop.f32.mrb[5].mxu1  ;;  %v2089_v54 = vmul.f32 %v2558_v10, %v2558_v10 }
 0x22b   : > { %v2048_v14 = vadd.f32 %v2047_v47, %v1822_v51  ;;  %v2087_v12 = vmul.f32 %v1822_v51, %v1822_v51  ;;  %v2559_v34 = vpop.f32.mrb[6].mxu1 }
 0x22c   : > { %v2468_v7 = vpack.c.bf16 %v2559_v34, %v2558_v10  ;;  %v1825_v24 = vpop.f32.mrb[7].mxu1  ;;  %v2090_v5 = vmul.f32 %v2559_v34, %v2559_v34 }
 0x22d   : > { %v2118_v46 = vadd.f32 %v2117_v1, %v2087_v12  ;;  %v2463_v25 = vpack.c.bf16 %v1825_v24, %v1822_v51  ;;  %v2049_v23 = vadd.f32 %v2048_v14, %v1825_v24  ;;  %v2088_v32 = vmul.f32 %v1825_v24, %v1825_v24 }
 0x22e   : > { %2500 = vst [vmem:[%s3584_s18 + $0x58] sm:$0xff] %v2468_v7  }
 0x22f   : > { %2499 = vst [vmem:[%s3584_s18 + $0x50] sm:$0xff] %v2463_v25   ;;  %v2050_v0 = vadd.f32 %v2558_v10, %v2049_v23  ;;  %v2119_v45 = vadd.f32 %v2118_v46, %v2088_v32 }
 0x231   : > { %v2120_v42 = vadd.f32 %v2119_v45, %v2089_v54  ;;  %v2051_v29 = vadd.f32 %v2559_v34, %v2050_v0 }
 0x233   : > { %v2121_v37 = vadd.f32 %v2120_v42, %v2090_v5 }
 0x249   : > { %v2562_v17 = vpop.f32.mrb[8].mxu1 }
 0x24a   : > { %v1838_v61 = vpop.f32.mrb[9].mxu1  ;;  %v2093_v35 = vmul.f32 %v2562_v17, %v2562_v17 }
 0x24b   : > { %v2052_v49 = vadd.f32 %v2051_v29, %v1838_v61  ;;  %v2091_v21 = vmul.f32 %v1838_v61, %v1838_v61  ;;  %v2563_v55 = vpop.f32.mrb[10].mxu1 }
 0x24c   : > { %v2478_v2 = vpack.c.bf16 %v2563_v55, %v2562_v17  ;;  %v1841_v30 = vpop.f32.mrb[11].mxu1  ;;  %v2094_v15 = vmul.f32 %v2563_v55, %v2563_v55 }
 0x24d   : > { %v2122_v9 = vadd.f32 %v2121_v37, %v2091_v21  ;;  %v2473_v33 = vpack.c.bf16 %v1841_v30, %v1838_v61  ;;  %v2053_v39 = vadd.f32 %v2052_v49, %v1841_v30  ;;  %v2092_v43 = vmul.f32 %v1841_v30, %v1841_v30 }
 0x24e   : > { %2502 = vst [vmem:[%s3584_s18 + $0x68] sm:$0xff] %v2478_v2  }
 0x24f   : > { %2501 = vst [vmem:[%s3584_s18 + $0x60] sm:$0xff] %v2473_v33   ;;  %v2054_v31 = vadd.f32 %v2562_v17, %v2053_v39  ;;  %v2123_v52 = vadd.f32 %v2122_v9, %v2092_v43 }
 0x251   : > { %v2124_v26 = vadd.f32 %v2123_v52, %v2093_v35  ;;  %v2055_v38 = vadd.f32 %v2563_v55, %v2054_v31 }
 0x253   : > { %v2125_v28 = vadd.f32 %v2124_v26, %v2094_v15 }
 0x266   : > { %v2566_v6 = vpop.f32.mrb[12].mxu1 }
 0x267   : > { %v1854_v53 = vpop.f32.mrb[13].mxu1  ;;  %v2097_v44 = vmul.f32 %v2566_v6, %v2566_v6 }
 0x268   : > { %v2056_v13 = vadd.f32 %v2055_v38, %v1854_v53  ;;  %v2095_v27 = vmul.f32 %v1854_v53, %v1854_v53  ;;  %v2567_v62 = vpop.f32.mrb[14].mxu1 }
 0x269   : > { %v2488_v41 = vpack.c.bf16 %v2567_v62, %v2566_v6  ;;  %v1857_v59 = vpop.f32.mrb[15].mxu1  ;;  %v2098_v58 = vmul.f32 %v2567_v62, %v2567_v62 }
 0x26a   : > { %v2126_v40 = vadd.f32 %v2125_v28, %v2095_v27  ;;  %v2483_v36 = vpack.c.bf16 %v1857_v59, %v1854_v53  ;;  %v2057_v60 = vadd.f32 %v2056_v13, %v1857_v59  ;;  %v2096_v50 = vmul.f32 %v1857_v59, %v1857_v59 }
 0x26b   : > { %2504 = vst [vmem:[%s3584_s18 + $0x78] sm:$0xff] %v2488_v41  }
 0x26c   : > { %2503 = vst [vmem:[%s3584_s18 + $0x70] sm:$0xff] %v2483_v36   ;;  %v2058_v4 = vadd.f32 %v2566_v6, %v2057_v60  ;;  %v2127_v56 = vadd.f32 %v2126_v40, %v2096_v50 }
 0x26e   : > { %v2059_v63 = vadd.f32 %v2567_v62, %v2058_v4  ;;  %v2128_v57 = vadd.f32 %v2127_v56, %v2097_v44 }
 0x270   : > { %v2060_v3 = vrot.slane %v2059_v63, 4  ;;  %v2129_v48 = vadd.f32 %v2128_v57, %v2098_v58 }
 0x272   : > { %v2061_v8 = vadd.f32 %v2060_v3, %v2059_v63  ;;  %v2130_v16 = vrot.slane %v2129_v48, 4 }
 0x274   : > { %v2062_v19 = vrot.slane %v2061_v8, 2  ;;  %v2131_v18 = vadd.f32 %v2130_v16, %v2129_v48 }
 0x276   : > { %v2063_v20 = vadd.f32 %v2062_v19, %v2061_v8  ;;  %v2132_v22 = vrot.slane %v2131_v18, 2 }
 0x278   : > { %v2064_v11 = vrot.slane %v2063_v20, 1  ;;  %v2133_v47 = vadd.f32 %v2132_v22, %v2131_v18 }
 0x27a   : > { %v2065_v1 = vadd.f32 %v2064_v11, %v2063_v20  ;;  %v2134_v10 = vrot.slane %v2133_v47, 1 }
 0x27c   : > { %2066 = vst [vmem:[%s211_s21] sm:$0x1] %v2065_v1  ;;  %v2135_v51 = vadd.f32 %v2134_v10, %v2133_v47 }
 0x27e   : > { %2136 = vst [vmem:[%s214_s24] sm:$0x1] %v2135_v51 }
 0x27f PF: > { %s15_s15 = sadd.s32 1, %s2625_s15  }
 0x280   : > { %p12_p4 = scmp.ge.s32.totalorder %s15_s15, 4  }
 0x282   :  { %14 = sbr.rel (!%p12_p4) target bundleno = 1 (0x1), region = 82 }

</bundles_post_ra>
